<compile_context>
chip_gen: v7x
topology: tpu7x:2x2x1
jax: 0.10.0
libtpu: 0.0.40
codegen_flags: <defaults>
</compile_context>

<pallas_src>
import jax
import jax.numpy as jnp
from jax.experimental import pallas as pl
from jax.experimental.pallas import tpu as pltpu

INPUT_SIZE = 300
HIDDEN_SIZE = 100
H_PAD = 128            # hidden padded to one full lane-register width
GATE_PAD = 4 * H_PAD   # 512 = 4 gates x 128 lanes


def make_lstm_fc_kernel(seq, batch):
    def kernel(x_ref, wih_ref, whh_ref, b_ref, wfc_ref, bfc_ref, out_ref, gx_scr):
        # ---- Phase 1: input projection for all timesteps at once (one big matmul). ----
        # x_ref: (seq*batch, INPUT_SIZE), wih_ref: (INPUT_SIZE, GATE_PAD)
        gx_scr[...] = (
            jnp.dot(x_ref[...], wih_ref[...], preferred_element_type=jnp.float32)
            + b_ref[...]
        )

        whh = whh_ref[...]  # (H_PAD, GATE_PAD), loaded once, reused every step

        # ---- Phase 2: serial recurrence, fully unrolled (seq is small & static). ----
        def step(t, carry):
            h, c = carry
            off = pl.multiple_of(t * batch, batch)
            gates = gx_scr[pl.ds(off, batch), :] + jnp.dot(
                h, whh, preferred_element_type=jnp.float32
            )
            # 128-aligned gate slabs -> pure VPU slicing, no cross-lane relayouts.
            i_g = jax.nn.sigmoid(gates[:, 0 * H_PAD:1 * H_PAD])
            f_g = jax.nn.sigmoid(gates[:, 1 * H_PAD:2 * H_PAD])
            g_g = jnp.tanh(gates[:, 2 * H_PAD:3 * H_PAD])
            o_g = jax.nn.sigmoid(gates[:, 3 * H_PAD:4 * H_PAD])
            c = f_g * c + i_g * g_g
            h = o_g * jnp.tanh(c)
            return (h, c)

        h0 = jnp.zeros((batch, H_PAD), jnp.float32)
        c0 = jnp.zeros((batch, H_PAD), jnp.float32)
        h, _ = jax.lax.fori_loop(0, seq, step, (h0, c0), unroll=True)

        # ---- Phase 3: Linear(100 -> 1) + Sigmoid, as VPU multiply + lane reduce. ----
        y = jnp.sum(h * wfc_ref[...], axis=-1, keepdims=True) + bfc_ref[...]
        out_ref[...] = jax.nn.sigmoid(y)

    return kernel


def lstm_model_forward(x, w_ih, w_hh, b_ih, b_hh, w_fc, b_fc):
    """x: (seq, batch, INPUT_SIZE). Returns (1, batch, 1) like the PyTorch model."""
    seq, batch, _ = x.shape
    H = HIDDEN_SIZE

    # --- Weight prep: transpose + pad every gate to a 128-lane slab (zeros elsewhere). ---
    wih_pad = jnp.zeros((INPUT_SIZE, GATE_PAD), jnp.float32)
    whh_pad = jnp.zeros((H_PAD, GATE_PAD), jnp.float32)
    b_pad = jnp.zeros((1, GATE_PAD), jnp.float32)
    b_sum = b_ih + b_hh
    for g in range(4):  # PyTorch gate order [i, f, g, o]
        wih_pad = wih_pad.at[:, g * H_PAD:g * H_PAD + H].set(w_ih[g * H:(g + 1) * H, :].T)
        whh_pad = whh_pad.at[:H, g * H_PAD:g * H_PAD + H].set(w_hh[g * H:(g + 1) * H, :].T)
        b_pad = b_pad.at[0, g * H_PAD:g * H_PAD + H].set(b_sum[g * H:(g + 1) * H])
    wfc_pad = jnp.zeros((1, H_PAD), jnp.float32).at[0, :H].set(w_fc[0])
    bfc = b_fc.reshape(1, 1).astype(jnp.float32)

    # Flatten time into the sublane (M) axis so the input projection is one big matmul.
    x_flat = x.reshape(seq * batch, INPUT_SIZE).astype(jnp.float32)

    flops = 2 * seq * batch * INPUT_SIZE * GATE_PAD + 2 * seq * batch * H_PAD * GATE_PAD
    transcendentals = 5 * seq * batch * H_PAD
    bytes_accessed = 4 * (
        seq * batch * INPUT_SIZE            # x
        + INPUT_SIZE * GATE_PAD             # W_ih (padded)
        + H_PAD * GATE_PAD                  # W_hh (padded)
        + GATE_PAD + H_PAD + 1              # biases + fc weight
        + batch                             # output
    )

    out = pl.pallas_call(
        make_lstm_fc_kernel(seq, batch),
        out_shape=jax.ShapeDtypeStruct((batch, 1), jnp.float32),
        grid_spec=pltpu.PrefetchScalarGridSpec(
            num_scalar_prefetch=0,
            grid=(1,),  # single invocation: whole problem fits comfortably in VMEM
            in_specs=[
                pl.BlockSpec((seq * batch, INPUT_SIZE), lambda i: (0, 0)),
                pl.BlockSpec((INPUT_SIZE, GATE_PAD), lambda i: (0, 0)),
                pl.BlockSpec((H_PAD, GATE_PAD), lambda i: (0, 0)),
                pl.BlockSpec((1, GATE_PAD), lambda i: (0, 0)),
                pl.BlockSpec((1, H_PAD), lambda i: (0, 0)),
                pl.BlockSpec((1, 1), lambda i: (0, 0)),
            ],
            out_specs=pl.BlockSpec((batch, 1), lambda i: (0, 0)),
            scratch_shapes=[
                pltpu.VMEM((seq * batch, GATE_PAD), jnp.float32),  # precomputed x@W_ih + b
            ],
        ),
        compiler_params=pltpu.CompilerParams(
            dimension_semantics=("arbitrary",)),
        cost_estimate=pl.CostEstimate(
            flops=flops,
            transcendentals=transcendentals,
            bytes_accessed=bytes_accessed,
        ),
    )(x_flat, wih_pad, whh_pad, b_pad, wfc_pad, bfc)
    # TODO(synk): optional bf16 weight cast (v6e/v7x) and seq-chunk streaming for very
    # long sequences on v7x's 64 MiB VMEM; unnecessary at these shapes.
    return out.reshape(1, batch, 1)


def reference_forward(x, w_ih, w_hh, b_ih, b_hh, w_fc, b_fc):
    """Pure-JAX reference reproducing torch.nn.LSTM + Linear + Sigmoid."""
    seq, batch, _ = x.shape
    H = HIDDEN_SIZE

    def step(carry, x_t):
        h, c = carry
        gates = x_t @ w_ih.T + h @ w_hh.T + b_ih + b_hh
        i = jax.nn.sigmoid(gates[:, 0 * H:1 * H])
        f = jax.nn.sigmoid(gates[:, 1 * H:2 * H])
        g = jnp.tanh(gates[:, 2 * H:3 * H])
        o = jax.nn.sigmoid(gates[:, 3 * H:4 * H])
        c = f * c + i * g
        h = o * jnp.tanh(c)
        return (h, c), None

    h0 = jnp.zeros((batch, H), jnp.float32)
    (h, _), _ = jax.lax.scan(step, (h0, h0), x)
    y = jax.nn.sigmoid(h @ w_fc.T + b_fc)
    return y.reshape(1, batch, 1)


if __name__ == "__main__":
    SEQ, BATCH = 8, 8
    key = jax.random.PRNGKey(0)
    ks = jax.random.split(key, 7)
    bound = 1.0 / (HIDDEN_SIZE ** 0.5)

    x = jax.random.normal(ks[0], (SEQ, BATCH, INPUT_SIZE), jnp.float32)
    w_ih = jax.random.uniform(ks[1], (4 * HIDDEN_SIZE, INPUT_SIZE), jnp.float32, -bound, bound)
    w_hh = jax.random.uniform(ks[2], (4 * HIDDEN_SIZE, HIDDEN_SIZE), jnp.float32, -bound, bound)
    b_ih = jax.random.uniform(ks[3], (4 * HIDDEN_SIZE,), jnp.float32, -bound, bound)
    b_hh = jax.random.uniform(ks[4], (4 * HIDDEN_SIZE,), jnp.float32, -bound, bound)
    w_fc = jax.random.uniform(ks[5], (1, HIDDEN_SIZE), jnp.float32, -bound, bound)
    b_fc = jax.random.uniform(ks[6], (1,), jnp.float32, -bound, bound)

    out = lstm_model_forward(x, w_ih, w_hh, b_ih, b_hh, w_fc, b_fc)
    out = jax.block_until_ready(out)

    ref = reference_forward(x, w_ih, w_hh, b_ih, b_hh, w_fc, b_fc)
    assert out.shape == (1, BATCH, 1), out.shape
    assert jnp.allclose(out, ref, atol=1e-5, rtol=1e-5), (out, ref)
    print("KERNEL_OK")
</pallas_src>

<mosaic_0001>
module attributes {stable_mosaic.version = 11 : i64} {
  func.func @kernel(%arg0: i32, %arg1: memref<64x300xf32, #tpu.memory_space<vmem>>, %arg2: memref<300x512xf32, #tpu.memory_space<vmem>>, %arg3: memref<128x512xf32, #tpu.memory_space<vmem>>, %arg4: memref<1x512xf32, #tpu.memory_space<vmem>>, %arg5: memref<1x128xf32, #tpu.memory_space<vmem>>, %arg6: memref<1x1xf32, #tpu.memory_space<vmem>>, %arg7: memref<8x1xf32, #tpu.memory_space<vmem>>, %arg8: memref<64x512xf32, #tpu.memory_space<vmem>>) attributes {dimension_semantics = [#tpu.dimension_semantics<arbitrary>], iteration_bounds = array<i64: 1>, scalar_prefetch = 0 : i64, scratch_operands = 1 : i64, tpu.core_type = #tpu.core_type<tc>, window_params = [{pipeline_mode = #tpu.pipeline_mode<synchronous>, transform_indices = @transform_0, window_bounds = array<i64: 64, 300>}, {pipeline_mode = #tpu.pipeline_mode<synchronous>, transform_indices = @transform_1, window_bounds = array<i64: 300, 512>}, {pipeline_mode = #tpu.pipeline_mode<synchronous>, transform_indices = @transform_2, window_bounds = array<i64: 128, 512>}, {pipeline_mode = #tpu.pipeline_mode<synchronous>, transform_indices = @transform_3, window_bounds = array<i64: 1, 512>}, {pipeline_mode = #tpu.pipeline_mode<synchronous>, transform_indices = @transform_4, window_bounds = array<i64: 1, 128>}, {pipeline_mode = #tpu.pipeline_mode<synchronous>, transform_indices = @transform_5, window_bounds = array<i64: 1, 1>}, {pipeline_mode = #tpu.pipeline_mode<synchronous>, transform_indices = @transform_6, window_bounds = array<i64: 8, 1>}]} {
    %c0 = arith.constant 0 : index
    %c0_0 = arith.constant 0 : index
    %0 = vector.load %arg1[%c0, %c0_0] : memref<64x300xf32, #tpu.memory_space<vmem>>, vector<64x300xf32>
    %c0_1 = arith.constant 0 : index
    %c0_2 = arith.constant 0 : index
    %1 = vector.load %arg2[%c0_1, %c0_2] : memref<300x512xf32, #tpu.memory_space<vmem>>, vector<300x512xf32>
    %cst = arith.constant dense<0.000000e+00> : vector<64x512xf32>
    %2 = tpu.matmul %0, %1, %cst {dimension_numbers = #tpu.dot_dimension_numbers<[1], [0], [0], [1], [0, 0, 1, 1], [], []>} : vector<64x300xf32>, vector<300x512xf32>, vector<64x512xf32> -> vector<64x512xf32>
    %c0_3 = arith.constant 0 : index
    %c0_4 = arith.constant 0 : index
    %3 = vector.load %arg4[%c0_3, %c0_4] : memref<1x512xf32, #tpu.memory_space<vmem>>, vector<1x512xf32>
    %4 = vector.broadcast %3 : vector<1x512xf32> to vector<64x512xf32>
    %5 = arith.addf %2, %4 : vector<64x512xf32>
    %c0_5 = arith.constant 0 : index
    %c0_6 = arith.constant 0 : index
    %6 = vector.load %arg8[%c0_5, %c0_6] : memref<64x512xf32, #tpu.memory_space<vmem>>, vector<64x512xf32>
    tpu.vector_store %arg8[%c0_5, %c0_6], %5 {strides = array<i32>} : memref<64x512xf32, #tpu.memory_space<vmem>>, vector<64x512xf32>,
    %c0_7 = arith.constant 0 : index
    %c0_8 = arith.constant 0 : index
    %7 = vector.load %arg3[%c0_7, %c0_8] : memref<128x512xf32, #tpu.memory_space<vmem>>, vector<128x512xf32>
    %cst_9 = arith.constant 0.000000e+00 : f32
    %8 = vector.broadcast %cst_9 : f32 to vector<8x128xf32>
    %cst_10 = arith.constant 0.000000e+00 : f32
    %9 = vector.broadcast %cst_10 : f32 to vector<8x128xf32>
    %c0_i32 = arith.constant 0 : i32
    %c8_i32 = arith.constant 8 : i32
    %10 = arith.muli %c0_i32, %c8_i32 : i32
    %11 = tpu.assume_multiple %10, 8 : i32
    %12 = arith.index_cast %11 : i32 to index
    %c0_11 = arith.constant 0 : index
    %13 = vector.load %arg8[%12, %c0_11] : memref<64x512xf32, #tpu.memory_space<vmem>>, vector<8x512xf32>
    %cst_12 = arith.constant dense<0.000000e+00> : vector<8x512xf32>
    %14 = tpu.matmul %8, %7, %cst_12 {dimension_numbers = #tpu.dot_dimension_numbers<[1], [0], [0], [1], [0, 0, 1, 1], [], []>} : vector<8x128xf32>, vector<128x512xf32>, vector<8x512xf32> -> vector<8x512xf32>
    %15 = arith.addf %13, %14 : vector<8x512xf32>
    %16 = vector.extract_strided_slice %15 {offsets = [0, 0], sizes = [8, 128], strides = [1, 1]} : vector<8x512xf32> to vector<8x128xf32>
    %17 = arith.negf %16 : vector<8x128xf32>
    %18 = math.exp %17 : vector<8x128xf32>
    %cst_13 = arith.constant 1.000000e+00 : f32
    %19 = vector.broadcast %cst_13 : f32 to vector<8x128xf32>
    %20 = arith.addf %19, %18 : vector<8x128xf32>
    %21 = arith.divf %19, %20 : vector<8x128xf32>
    %22 = vector.extract_strided_slice %15 {offsets = [0, 128], sizes = [8, 128], strides = [1, 1]} : vector<8x512xf32> to vector<8x128xf32>
    %23 = arith.negf %22 : vector<8x128xf32>
    %24 = math.exp %23 : vector<8x128xf32>
    %cst_14 = arith.constant 1.000000e+00 : f32
    %25 = vector.broadcast %cst_14 : f32 to vector<8x128xf32>
    %26 = arith.addf %25, %24 : vector<8x128xf32>
    %27 = arith.divf %25, %26 : vector<8x128xf32>
    %28 = vector.extract_strided_slice %15 {offsets = [0, 256], sizes = [8, 128], strides = [1, 1]} : vector<8x512xf32> to vector<8x128xf32>
    %29 = math.tanh %28 : vector<8x128xf32>
    %30 = vector.extract_strided_slice %15 {offsets = [0, 384], sizes = [8, 128], strides = [1, 1]} : vector<8x512xf32> to vector<8x128xf32>
    %31 = arith.negf %30 : vector<8x128xf32>
    %32 = math.exp %31 : vector<8x128xf32>
    %cst_15 = arith.constant 1.000000e+00 : f32
    %33 = vector.broadcast %cst_15 : f32 to vector<8x128xf32>
    %34 = arith.addf %33, %32 : vector<8x128xf32>
    %35 = arith.divf %33, %34 : vector<8x128xf32>
    %36 = arith.mulf %27, %9 : vector<8x128xf32>
    %37 = arith.mulf %21, %29 : vector<8x128xf32>
    %38 = arith.addf %36, %37 : vector<8x128xf32>
    %39 = math.tanh %38 : vector<8x128xf32>
    %40 = arith.mulf %35, %39 : vector<8x128xf32>
    %c1_i32 = arith.constant 1 : i32
    %c8_i32_16 = arith.constant 8 : i32
    %41 = arith.muli %c1_i32, %c8_i32_16 : i32
    %42 = tpu.assume_multiple %41, 8 : i32
    %43 = arith.index_cast %42 : i32 to index
    %c0_17 = arith.constant 0 : index
    %44 = vector.load %arg8[%43, %c0_17] : memref<64x512xf32, #tpu.memory_space<vmem>>, vector<8x512xf32>
    %cst_18 = arith.constant dense<0.000000e+00> : vector<8x512xf32>
    %45 = tpu.matmul %40, %7, %cst_18 {dimension_numbers = #tpu.dot_dimension_numbers<[1], [0], [0], [1], [0, 0, 1, 1], [], []>} : vector<8x128xf32>, vector<128x512xf32>, vector<8x512xf32> -> vector<8x512xf32>
    %46 = arith.addf %44, %45 : vector<8x512xf32>
    %47 = vector.extract_strided_slice %46 {offsets = [0, 0], sizes = [8, 128], strides = [1, 1]} : vector<8x512xf32> to vector<8x128xf32>
    %48 = arith.negf %47 : vector<8x128xf32>
    %49 = math.exp %48 : vector<8x128xf32>
    %cst_19 = arith.constant 1.000000e+00 : f32
    %50 = vector.broadcast %cst_19 : f32 to vector<8x128xf32>
    %51 = arith.addf %50, %49 : vector<8x128xf32>
    %52 = arith.divf %50, %51 : vector<8x128xf32>
    %53 = vector.extract_strided_slice %46 {offsets = [0, 128], sizes = [8, 128], strides = [1, 1]} : vector<8x512xf32> to vector<8x128xf32>
    %54 = arith.negf %53 : vector<8x128xf32>
    %55 = math.exp %54 : vector<8x128xf32>
    %cst_20 = arith.constant 1.000000e+00 : f32
    %56 = vector.broadcast %cst_20 : f32 to vector<8x128xf32>
    %57 = arith.addf %56, %55 : vector<8x128xf32>
    %58 = arith.divf %56, %57 : vector<8x128xf32>
    %59 = vector.extract_strided_slice %46 {offsets = [0, 256], sizes = [8, 128], strides = [1, 1]} : vector<8x512xf32> to vector<8x128xf32>
    %60 = math.tanh %59 : vector<8x128xf32>
    %61 = vector.extract_strided_slice %46 {offsets = [0, 384], sizes = [8, 128], strides = [1, 1]} : vector<8x512xf32> to vector<8x128xf32>
    %62 = arith.negf %61 : vector<8x128xf32>
    %63 = math.exp %62 : vector<8x128xf32>
    %cst_21 = arith.constant 1.000000e+00 : f32
    %64 = vector.broadcast %cst_21 : f32 to vector<8x128xf32>
    %65 = arith.addf %64, %63 : vector<8x128xf32>
    %66 = arith.divf %64, %65 : vector<8x128xf32>
    %67 = arith.mulf %58, %38 : vector<8x128xf32>
    %68 = arith.mulf %52, %60 : vector<8x128xf32>
    %69 = arith.addf %67, %68 : vector<8x128xf32>
    %70 = math.tanh %69 : vector<8x128xf32>
    %71 = arith.mulf %66, %70 : vector<8x128xf32>
    %c2_i32 = arith.constant 2 : i32
    %c8_i32_22 = arith.constant 8 : i32
    %72 = arith.muli %c2_i32, %c8_i32_22 : i32
    %73 = tpu.assume_multiple %72, 8 : i32
    %74 = arith.index_cast %73 : i32 to index
    %c0_23 = arith.constant 0 : index
    %75 = vector.load %arg8[%74, %c0_23] : memref<64x512xf32, #tpu.memory_space<vmem>>, vector<8x512xf32>
    %cst_24 = arith.constant dense<0.000000e+00> : vector<8x512xf32>
    %76 = tpu.matmul %71, %7, %cst_24 {dimension_numbers = #tpu.dot_dimension_numbers<[1], [0], [0], [1], [0, 0, 1, 1], [], []>} : vector<8x128xf32>, vector<128x512xf32>, vector<8x512xf32> -> vector<8x512xf32>
    %77 = arith.addf %75, %76 : vector<8x512xf32>
    %78 = vector.extract_strided_slice %77 {offsets = [0, 0], sizes = [8, 128], strides = [1, 1]} : vector<8x512xf32> to vector<8x128xf32>
    %79 = arith.negf %78 : vector<8x128xf32>
    %80 = math.exp %79 : vector<8x128xf32>
    %cst_25 = arith.constant 1.000000e+00 : f32
    %81 = vector.broadcast %cst_25 : f32 to vector<8x128xf32>
    %82 = arith.addf %81, %80 : vector<8x128xf32>
    %83 = arith.divf %81, %82 : vector<8x128xf32>
    %84 = vector.extract_strided_slice %77 {offsets = [0, 128], sizes = [8, 128], strides = [1, 1]} : vector<8x512xf32> to vector<8x128xf32>
    %85 = arith.negf %84 : vector<8x128xf32>
    %86 = math.exp %85 : vector<8x128xf32>
    %cst_26 = arith.constant 1.000000e+00 : f32
    %87 = vector.broadcast %cst_26 : f32 to vector<8x128xf32>
    %88 = arith.addf %87, %86 : vector<8x128xf32>
    %89 = arith.divf %87, %88 : vector<8x128xf32>
    %90 = vector.extract_strided_slice %77 {offsets = [0, 256], sizes = [8, 128], strides = [1, 1]} : vector<8x512xf32> to vector<8x128xf32>
    %91 = math.tanh %90 : vector<8x128xf32>
    %92 = vector.extract_strided_slice %77 {offsets = [0, 384], sizes = [8, 128], strides = [1, 1]} : vector<8x512xf32> to vector<8x128xf32>
    %93 = arith.negf %92 : vector<8x128xf32>
    %94 = math.exp %93 : vector<8x128xf32>
    %cst_27 = arith.constant 1.000000e+00 : f32
    %95 = vector.broadcast %cst_27 : f32 to vector<8x128xf32>
    %96 = arith.addf %95, %94 : vector<8x128xf32>
    %97 = arith.divf %95, %96 : vector<8x128xf32>
    %98 = arith.mulf %89, %69 : vector<8x128xf32>
    %99 = arith.mulf %83, %91 : vector<8x128xf32>
    %100 = arith.addf %98, %99 : vector<8x128xf32>
    %101 = math.tanh %100 : vector<8x128xf32>
    %102 = arith.mulf %97, %101 : vector<8x128xf32>
    %c3_i32 = arith.constant 3 : i32
    %c8_i32_28 = arith.constant 8 : i32
    %103 = arith.muli %c3_i32, %c8_i32_28 : i32
    %104 = tpu.assume_multiple %103, 8 : i32
    %105 = arith.index_cast %104 : i32 to index
    %c0_29 = arith.constant 0 : index
    %106 = vector.load %arg8[%105, %c0_29] : memref<64x512xf32, #tpu.memory_space<vmem>>, vector<8x512xf32>
    %cst_30 = arith.constant dense<0.000000e+00> : vector<8x512xf32>
    %107 = tpu.matmul %102, %7, %cst_30 {dimension_numbers = #tpu.dot_dimension_numbers<[1], [0], [0], [1], [0, 0, 1, 1], [], []>} : vector<8x128xf32>, vector<128x512xf32>, vector<8x512xf32> -> vector<8x512xf32>
    %108 = arith.addf %106, %107 : vector<8x512xf32>
    %109 = vector.extract_strided_slice %108 {offsets = [0, 0], sizes = [8, 128], strides = [1, 1]} : vector<8x512xf32> to vector<8x128xf32>
    %110 = arith.negf %109 : vector<8x128xf32>
    %111 = math.exp %110 : vector<8x128xf32>
    %cst_31 = arith.constant 1.000000e+00 : f32
    %112 = vector.broadcast %cst_31 : f32 to vector<8x128xf32>
    %113 = arith.addf %112, %111 : vector<8x128xf32>
    %114 = arith.divf %112, %113 : vector<8x128xf32>
    %115 = vector.extract_strided_slice %108 {offsets = [0, 128], sizes = [8, 128], strides = [1, 1]} : vector<8x512xf32> to vector<8x128xf32>
    %116 = arith.negf %115 : vector<8x128xf32>
    %117 = math.exp %116 : vector<8x128xf32>
    %cst_32 = arith.constant 1.000000e+00 : f32
    %118 = vector.broadcast %cst_32 : f32 to vector<8x128xf32>
    %119 = arith.addf %118, %117 : vector<8x128xf32>
    %120 = arith.divf %118, %119 : vector<8x128xf32>
    %121 = vector.extract_strided_slice %108 {offsets = [0, 256], sizes = [8, 128], strides = [1, 1]} : vector<8x512xf32> to vector<8x128xf32>
    %122 = math.tanh %121 : vector<8x128xf32>
    %123 = vector.extract_strided_slice %108 {offsets = [0, 384], sizes = [8, 128], strides = [1, 1]} : vector<8x512xf32> to vector<8x128xf32>
    %124 = arith.negf %123 : vector<8x128xf32>
    %125 = math.exp %124 : vector<8x128xf32>
    %cst_33 = arith.constant 1.000000e+00 : f32
    %126 = vector.broadcast %cst_33 : f32 to vector<8x128xf32>
    %127 = arith.addf %126, %125 : vector<8x128xf32>
    %128 = arith.divf %126, %127 : vector<8x128xf32>
    %129 = arith.mulf %120, %100 : vector<8x128xf32>
    %130 = arith.mulf %114, %122 : vector<8x128xf32>
    %131 = arith.addf %129, %130 : vector<8x128xf32>
    %132 = math.tanh %131 : vector<8x128xf32>
    %133 = arith.mulf %128, %132 : vector<8x128xf32>
    %c4_i32 = arith.constant 4 : i32
    %c8_i32_34 = arith.constant 8 : i32
    %134 = arith.muli %c4_i32, %c8_i32_34 : i32
    %135 = tpu.assume_multiple %134, 8 : i32
    %136 = arith.index_cast %135 : i32 to index
    %c0_35 = arith.constant 0 : index
    %137 = vector.load %arg8[%136, %c0_35] : memref<64x512xf32, #tpu.memory_space<vmem>>, vector<8x512xf32>
    %cst_36 = arith.constant dense<0.000000e+00> : vector<8x512xf32>
    %138 = tpu.matmul %133, %7, %cst_36 {dimension_numbers = #tpu.dot_dimension_numbers<[1], [0], [0], [1], [0, 0, 1, 1], [], []>} : vector<8x128xf32>, vector<128x512xf32>, vector<8x512xf32> -> vector<8x512xf32>
    %139 = arith.addf %137, %138 : vector<8x512xf32>
    %140 = vector.extract_strided_slice %139 {offsets = [0, 0], sizes = [8, 128], strides = [1, 1]} : vector<8x512xf32> to vector<8x128xf32>
    %141 = arith.negf %140 : vector<8x128xf32>
    %142 = math.exp %141 : vector<8x128xf32>
    %cst_37 = arith.constant 1.000000e+00 : f32
    %143 = vector.broadcast %cst_37 : f32 to vector<8x128xf32>
    %144 = arith.addf %143, %142 : vector<8x128xf32>
    %145 = arith.divf %143, %144 : vector<8x128xf32>
    %146 = vector.extract_strided_slice %139 {offsets = [0, 128], sizes = [8, 128], strides = [1, 1]} : vector<8x512xf32> to vector<8x128xf32>
    %147 = arith.negf %146 : vector<8x128xf32>
    %148 = math.exp %147 : vector<8x128xf32>
    %cst_38 = arith.constant 1.000000e+00 : f32
    %149 = vector.broadcast %cst_38 : f32 to vector<8x128xf32>
    %150 = arith.addf %149, %148 : vector<8x128xf32>
    %151 = arith.divf %149, %150 : vector<8x128xf32>
    %152 = vector.extract_strided_slice %139 {offsets = [0, 256], sizes = [8, 128], strides = [1, 1]} : vector<8x512xf32> to vector<8x128xf32>
    %153 = math.tanh %152 : vector<8x128xf32>
    %154 = vector.extract_strided_slice %139 {offsets = [0, 384], sizes = [8, 128], strides = [1, 1]} : vector<8x512xf32> to vector<8x128xf32>
    %155 = arith.negf %154 : vector<8x128xf32>
    %156 = math.exp %155 : vector<8x128xf32>
    %cst_39 = arith.constant 1.000000e+00 : f32
    %157 = vector.broadcast %cst_39 : f32 to vector<8x128xf32>
    %158 = arith.addf %157, %156 : vector<8x128xf32>
    %159 = arith.divf %157, %158 : vector<8x128xf32>
    %160 = arith.mulf %151, %131 : vector<8x128xf32>
    %161 = arith.mulf %145, %153 : vector<8x128xf32>
    %162 = arith.addf %160, %161 : vector<8x128xf32>
    %163 = math.tanh %162 : vector<8x128xf32>
    %164 = arith.mulf %159, %163 : vector<8x128xf32>
    %c5_i32 = arith.constant 5 : i32
    %c8_i32_40 = arith.constant 8 : i32
    %165 = arith.muli %c5_i32, %c8_i32_40 : i32
    %166 = tpu.assume_multiple %165, 8 : i32
    %167 = arith.index_cast %166 : i32 to index
    %c0_41 = arith.constant 0 : index
    %168 = vector.load %arg8[%167, %c0_41] : memref<64x512xf32, #tpu.memory_space<vmem>>, vector<8x512xf32>
    %cst_42 = arith.constant dense<0.000000e+00> : vector<8x512xf32>
    %169 = tpu.matmul %164, %7, %cst_42 {dimension_numbers = #tpu.dot_dimension_numbers<[1], [0], [0], [1], [0, 0, 1, 1], [], []>} : vector<8x128xf32>, vector<128x512xf32>, vector<8x512xf32> -> vector<8x512xf32>
    %170 = arith.addf %168, %169 : vector<8x512xf32>
    %171 = vector.extract_strided_slice %170 {offsets = [0, 0], sizes = [8, 128], strides = [1, 1]} : vector<8x512xf32> to vector<8x128xf32>
    %172 = arith.negf %171 : vector<8x128xf32>
    %173 = math.exp %172 : vector<8x128xf32>
    %cst_43 = arith.constant 1.000000e+00 : f32
    %174 = vector.broadcast %cst_43 : f32 to vector<8x128xf32>
    %175 = arith.addf %174, %173 : vector<8x128xf32>
    %176 = arith.divf %174, %175 : vector<8x128xf32>
    %177 = vector.extract_strided_slice %170 {offsets = [0, 128], sizes = [8, 128], strides = [1, 1]} : vector<8x512xf32> to vector<8x128xf32>
    %178 = arith.negf %177 : vector<8x128xf32>
    %179 = math.exp %178 : vector<8x128xf32>
    %cst_44 = arith.constant 1.000000e+00 : f32
    %180 = vector.broadcast %cst_44 : f32 to vector<8x128xf32>
    %181 = arith.addf %180, %179 : vector<8x128xf32>
    %182 = arith.divf %180, %181 : vector<8x128xf32>
    %183 = vector.extract_strided_slice %170 {offsets = [0, 256], sizes = [8, 128], strides = [1, 1]} : vector<8x512xf32> to vector<8x128xf32>
    %184 = math.tanh %183 : vector<8x128xf32>
    %185 = vector.extract_strided_slice %170 {offsets = [0, 384], sizes = [8, 128], strides = [1, 1]} : vector<8x512xf32> to vector<8x128xf32>
    %186 = arith.negf %185 : vector<8x128xf32>
    %187 = math.exp %186 : vector<8x128xf32>
    %cst_45 = arith.constant 1.000000e+00 : f32
    %188 = vector.broadcast %cst_45 : f32 to vector<8x128xf32>
    %189 = arith.addf %188, %187 : vector<8x128xf32>
    %190 = arith.divf %188, %189 : vector<8x128xf32>
    %191 = arith.mulf %182, %162 : vector<8x128xf32>
    %192 = arith.mulf %176, %184 : vector<8x128xf32>
    %193 = arith.addf %191, %192 : vector<8x128xf32>
    %194 = math.tanh %193 : vector<8x128xf32>
    %195 = arith.mulf %190, %194 : vector<8x128xf32>
    %c6_i32 = arith.constant 6 : i32
    %c8_i32_46 = arith.constant 8 : i32
    %196 = arith.muli %c6_i32, %c8_i32_46 : i32
    %197 = tpu.assume_multiple %196, 8 : i32
    %198 = arith.index_cast %197 : i32 to index
    %c0_47 = arith.constant 0 : index
    %199 = vector.load %arg8[%198, %c0_47] : memref<64x512xf32, #tpu.memory_space<vmem>>, vector<8x512xf32>
    %cst_48 = arith.constant dense<0.000000e+00> : vector<8x512xf32>
    %200 = tpu.matmul %195, %7, %cst_48 {dimension_numbers = #tpu.dot_dimension_numbers<[1], [0], [0], [1], [0, 0, 1, 1], [], []>} : vector<8x128xf32>, vector<128x512xf32>, vector<8x512xf32> -> vector<8x512xf32>
    %201 = arith.addf %199, %200 : vector<8x512xf32>
    %202 = vector.extract_strided_slice %201 {offsets = [0, 0], sizes = [8, 128], strides = [1, 1]} : vector<8x512xf32> to vector<8x128xf32>
    %203 = arith.negf %202 : vector<8x128xf32>
    %204 = math.exp %203 : vector<8x128xf32>
    %cst_49 = arith.constant 1.000000e+00 : f32
    %205 = vector.broadcast %cst_49 : f32 to vector<8x128xf32>
    %206 = arith.addf %205, %204 : vector<8x128xf32>
    %207 = arith.divf %205, %206 : vector<8x128xf32>
    %208 = vector.extract_strided_slice %201 {offsets = [0, 128], sizes = [8, 128], strides = [1, 1]} : vector<8x512xf32> to vector<8x128xf32>
    %209 = arith.negf %208 : vector<8x128xf32>
    %210 = math.exp %209 : vector<8x128xf32>
    %cst_50 = arith.constant 1.000000e+00 : f32
    %211 = vector.broadcast %cst_50 : f32 to vector<8x128xf32>
    %212 = arith.addf %211, %210 : vector<8x128xf32>
    %213 = arith.divf %211, %212 : vector<8x128xf32>
    %214 = vector.extract_strided_slice %201 {offsets = [0, 256], sizes = [8, 128], strides = [1, 1]} : vector<8x512xf32> to vector<8x128xf32>
    %215 = math.tanh %214 : vector<8x128xf32>
    %216 = vector.extract_strided_slice %201 {offsets = [0, 384], sizes = [8, 128], strides = [1, 1]} : vector<8x512xf32> to vector<8x128xf32>
    %217 = arith.negf %216 : vector<8x128xf32>
    %218 = math.exp %217 : vector<8x128xf32>
    %cst_51 = arith.constant 1.000000e+00 : f32
    %219 = vector.broadcast %cst_51 : f32 to vector<8x128xf32>
    %220 = arith.addf %219, %218 : vector<8x128xf32>
    %221 = arith.divf %219, %220 : vector<8x128xf32>
    %222 = arith.mulf %213, %193 : vector<8x128xf32>
    %223 = arith.mulf %207, %215 : vector<8x128xf32>
    %224 = arith.addf %222, %223 : vector<8x128xf32>
    %225 = math.tanh %224 : vector<8x128xf32>
    %226 = arith.mulf %221, %225 : vector<8x128xf32>
    %c7_i32 = arith.constant 7 : i32
    %c8_i32_52 = arith.constant 8 : i32
    %227 = arith.muli %c7_i32, %c8_i32_52 : i32
    %228 = tpu.assume_multiple %227, 8 : i32
    %229 = arith.index_cast %228 : i32 to index
    %c0_53 = arith.constant 0 : index
    %230 = vector.load %arg8[%229, %c0_53] : memref<64x512xf32, #tpu.memory_space<vmem>>, vector<8x512xf32>
    %cst_54 = arith.constant dense<0.000000e+00> : vector<8x512xf32>
    %231 = tpu.matmul %226, %7, %cst_54 {dimension_numbers = #tpu.dot_dimension_numbers<[1], [0], [0], [1], [0, 0, 1, 1], [], []>} : vector<8x128xf32>, vector<128x512xf32>, vector<8x512xf32> -> vector<8x512xf32>
    %232 = arith.addf %230, %231 : vector<8x512xf32>
    %233 = vector.extract_strided_slice %232 {offsets = [0, 0], sizes = [8, 128], strides = [1, 1]} : vector<8x512xf32> to vector<8x128xf32>
    %234 = arith.negf %233 : vector<8x128xf32>
    %235 = math.exp %234 : vector<8x128xf32>
    %cst_55 = arith.constant 1.000000e+00 : f32
    %236 = vector.broadcast %cst_55 : f32 to vector<8x128xf32>
    %237 = arith.addf %236, %235 : vector<8x128xf32>
    %238 = arith.divf %236, %237 : vector<8x128xf32>
    %239 = vector.extract_strided_slice %232 {offsets = [0, 128], sizes = [8, 128], strides = [1, 1]} : vector<8x512xf32> to vector<8x128xf32>
    %240 = arith.negf %239 : vector<8x128xf32>
    %241 = math.exp %240 : vector<8x128xf32>
    %cst_56 = arith.constant 1.000000e+00 : f32
    %242 = vector.broadcast %cst_56 : f32 to vector<8x128xf32>
    %243 = arith.addf %242, %241 : vector<8x128xf32>
    %244 = arith.divf %242, %243 : vector<8x128xf32>
    %245 = vector.extract_strided_slice %232 {offsets = [0, 256], sizes = [8, 128], strides = [1, 1]} : vector<8x512xf32> to vector<8x128xf32>
    %246 = math.tanh %245 : vector<8x128xf32>
    %247 = vector.extract_strided_slice %232 {offsets = [0, 384], sizes = [8, 128], strides = [1, 1]} : vector<8x512xf32> to vector<8x128xf32>
    %248 = arith.negf %247 : vector<8x128xf32>
    %249 = math.exp %248 : vector<8x128xf32>
    %cst_57 = arith.constant 1.000000e+00 : f32
    %250 = vector.broadcast %cst_57 : f32 to vector<8x128xf32>
    %251 = arith.addf %250, %249 : vector<8x128xf32>
    %252 = arith.divf %250, %251 : vector<8x128xf32>
    %253 = arith.mulf %244, %224 : vector<8x128xf32>
    %254 = arith.mulf %238, %246 : vector<8x128xf32>
    %255 = arith.addf %253, %254 : vector<8x128xf32>
    %256 = math.tanh %255 : vector<8x128xf32>
    %257 = arith.mulf %252, %256 : vector<8x128xf32>
    %c8_i32_58 = arith.constant 8 : i32
    %c0_59 = arith.constant 0 : index
    %c0_60 = arith.constant 0 : index
    %258 = vector.load %arg5[%c0_59, %c0_60] : memref<1x128xf32, #tpu.memory_space<vmem>>, vector<1x128xf32>
    %259 = vector.broadcast %258 : vector<1x128xf32> to vector<8x128xf32>
    %260 = arith.mulf %257, %259 : vector<8x128xf32>
    %cst_61 = arith.constant dense<0.000000e+00> : vector<8xf32>
    %261 = vector.multi_reduction <add>, %260, %cst_61 [1] : vector<8x128xf32> to vector<8xf32>
    %262 = vector.shape_cast %261 : vector<8xf32> to vector<8x1xf32>
    %c0_62 = arith.constant 0 : index
    %c0_63 = arith.constant 0 : index
    %263 = vector.load %arg6[%c0_62, %c0_63] : memref<1x1xf32, #tpu.memory_space<vmem>>, vector<1x1xf32>
    %264 = vector.broadcast %263 : vector<1x1xf32> to vector<8x1xf32>
    %265 = arith.addf %262, %264 : vector<8x1xf32>
    %266 = arith.negf %265 : vector<8x1xf32>
    %267 = math.exp %266 : vector<8x1xf32>
    %cst_64 = arith.constant 1.000000e+00 : f32
    %268 = vector.broadcast %cst_64 : f32 to vector<8x1xf32>
    %269 = arith.addf %268, %267 : vector<8x1xf32>
    %270 = arith.divf %268, %269 : vector<8x1xf32>
    %c0_65 = arith.constant 0 : index
    %c0_66 = arith.constant 0 : index
    %271 = vector.load %arg7[%c0_65, %c0_66] : memref<8x1xf32, #tpu.memory_space<vmem>>, vector<8x1xf32>
    tpu.vector_store %arg7[%c0_65, %c0_66], %270 {strides = array<i32>} : memref<8x1xf32, #tpu.memory_space<vmem>>, vector<8x1xf32>,
    return
  }
  func.func @transform_0(%arg0: i32) -> (i32, i32) {
    %c0_i32 = arith.constant 0 : i32
    %c0_i32_0 = arith.constant 0 : i32
    %c0_i32_1 = arith.constant 0 : i32
    return %c0_i32, %c0_i32_0 : i32, i32
  }
  func.func @transform_1(%arg0: i32) -> (i32, i32) {
    %c0_i32 = arith.constant 0 : i32
    %c0_i32_0 = arith.constant 0 : i32
    %c0_i32_1 = arith.constant 0 : i32
    return %c0_i32, %c0_i32_0 : i32, i32
  }
  func.func @transform_2(%arg0: i32) -> (i32, i32) {
    %c0_i32 = arith.constant 0 : i32
    %c0_i32_0 = arith.constant 0 : i32
    %c0_i32_1 = arith.constant 0 : i32
    return %c0_i32, %c0_i32_0 : i32, i32
  }
  func.func @transform_3(%arg0: i32) -> (i32, i32) {
    %c0_i32 = arith.constant 0 : i32
    %c0_i32_0 = arith.constant 0 : i32
    %c0_i32_1 = arith.constant 0 : i32
    return %c0_i32, %c0_i32_0 : i32, i32
  }
  func.func @transform_4(%arg0: i32) -> (i32, i32) {
    %c0_i32 = arith.constant 0 : i32
    %c0_i32_0 = arith.constant 0 : i32
    %c0_i32_1 = arith.constant 0 : i32
    return %c0_i32, %c0_i32_0 : i32, i32
  }
  func.func @transform_5(%arg0: i32) -> (i32, i32) {
    %c0_i32 = arith.constant 0 : i32
    %c0_i32_0 = arith.constant 0 : i32
    %c0_i32_1 = arith.constant 0 : i32
    return %c0_i32, %c0_i32_0 : i32, i32
  }
  func.func @transform_6(%arg0: i32) -> (i32, i32) {
    %c0_i32 = arith.constant 0 : i32
    %c0_i32_0 = arith.constant 0 : i32
    %c0_i32_1 = arith.constant 0 : i32
    return %c0_i32, %c0_i32_0 : i32, i32
  }
}

</mosaic_0001>

<bundles_post_ra>
// kernel: tpu_custom_call.1
= control target key start
LH: loop header
LB: loop body
LE: loop exit
PB: predicated region body
PF: predicated region fallthrough
CT: control target
= control target key end

     0   :  { %s3872_s0 = inlined_call_operand.hbm [shape: f32[64,300], index: 0, kind: input, shape index: {}]   ;;  %s3873_s1 = inlined_call_operand.hbm [shape: f32[300,512], index: 1, kind: input, shape index: {}]   ;;  %s3874_s2 = inlined_call_operand.hbm [shape: f32[128,512], index: 2, kind: input, shape index: {}]   ;;  %s3875_s3 = inlined_call_operand.vmem [shape: f32[1,512], index: 3, kind: input, shape index: {}]   ;;  %s3876_s4 = inlined_call_operand.vmem [shape: f32[1,128], index: 4, kind: input, shape index: {}]   ;;  %s3877_s5 = inlined_call_operand.<no memory space> [shape: f32[1,1], index: 5, kind: input, shape index: {}]   ;;  %s3878_s6 = inlined_call_operand.vmem [shape: f32[8,1], index: 6, kind: output, shape index: {}]  }
   0x1   :  { %v11_v0 = vstv %s3877_s5 }
   0x2   :  { %12 = vst [vmem:[#allocation3] sm:$0x1] %v11_v0 }
   0x3   :  { %13 = vsyncpa [#allocation5], 0 }
   0x4   :  { %14 = vsyncpa [#allocation7], 0  ;;  %s3327_s23 = smov [#allocation6]   ;;  %s3257_s27 = scalar_lea.hbm %s3873_s1, 19456 }
   0x5   :  { %s32_s24 = sshll.u32 %s3327_s23, 4  ;;  %p3258_p0 = scmp.ne.s32.totalorder %s3873_s1, %s3257_s27  ;;  %s33_s24 = int_to_ptr.vmem [resolvable:$true] %s32_s24 }
   0x6   :  { %p3261_p1 = scmp.lt.u32.totalorder %s3257_s27, %s3873_s1 }
   0x8   :  { %p3263_p2 = pnand %p3261_p1, %p3258_p0 }
   0xa   :  { %3266 = shalt.err (!%p3263_p2)
}
   0xb   :  { %s3267_s5 = scalar_lea.vmem %s33_s24, 19456  ;;  %p3272_p4 = scmp.lt.s32.totalorder %s33_s24, %s33_s24 }
   0xc   :  { %p3268_p3 = scmp.ne.s32.totalorder %s33_s24, %s3267_s5  ;;  %p3273_p5 = scmp.lt.s32.totalorder %s3267_s5, %s3267_s5 }
   0xe   :  { %p3274_p6 = por %p3273_p5, %p3272_p4 }
  0x10   :  { %p3275_p7 = pnand %p3274_p6, %p3268_p3 }
  0x12   :  { %3278 = shalt.err (!%p3275_p7)
}
  0x13   :  { %s3328_s8 = smov 512   ;;  %s3329_s9 = smov 32  }
  0x14   :  { %38 = dma.hbm_to_vmem [thread:$0]  %s3873_s1, 19456, %s33_s24, [#allocation7], %s3328_s8, %s3328_s8, %s3329_s9  }
  0x15   :  { %s3330_s12 = smov [#allocation4]   ;;  %s3279_s16 = scalar_lea.hbm %s3872_s0, 3072 }
  0x16   :  { %s20_s13 = sshll.u32 %s3330_s12, 4  ;;  %p3280_p8 = scmp.ne.s32.totalorder %s3872_s0, %s3279_s16  ;;  %s21_s13 = int_to_ptr.vmem [resolvable:$true] %s20_s13 }
  0x17   :  { %p3283_p9 = scmp.lt.u32.totalorder %s3279_s16, %s3872_s0 }
  0x19   :  { %p3285_p10 = pnand %p3283_p9, %p3280_p8 }
  0x1b   :  { %3288 = shalt.err (!%p3285_p10)
}
  0x1c   :  { %s3289_s21 = scalar_lea.vmem %s21_s13, 3072  ;;  %p3294_p12 = scmp.lt.s32.totalorder %s21_s13, %s21_s13 }
  0x1d   :  { %p3290_p11 = scmp.ne.s32.totalorder %s21_s13, %s3289_s21  ;;  %p3295_p13 = scmp.lt.s32.totalorder %s3289_s21, %s3289_s21 }
  0x1f   :  { %p3296_p0 = por %p3295_p13, %p3294_p12 }
  0x21   :  { %p3297_p1 = pnand %p3296_p0, %p3290_p11 }
  0x23   :  { %3300 = shalt.err (!%p3297_p1)
}
  0x24   :  { %s3331_s1 = smov 384   ;;  %s3332_s22 = smov 24  }
  0x25   :  { %26 = dma.hbm_to_vmem [thread:$0]  %s3872_s0, 3072, %s21_s13, [#allocation5], %s3331_s1, %s3331_s1, %s3332_s22  }
  0x26   :  { %s3333_s25 = smov [#allocation8]   ;;  %s3301_s29 = scalar_lea.hbm %s3874_s2, 8192 }
  0x27   :  { %s44_s26 = sshll.u32 %s3333_s25, 4  ;;  %p3302_p2 = scmp.ne.s32.totalorder %s3874_s2, %s3301_s29  ;;  %s45_s26 = int_to_ptr.vmem [resolvable:$true] %s44_s26 }
  0x28   :  { %p3305_p3 = scmp.lt.u32.totalorder %s3301_s29, %s3874_s2 }
  0x2a   :  { %p3307_p4 = pnand %p3305_p3, %p3302_p2 }
  0x2c   :  { %3310 = shalt.err (!%p3307_p4)
}
  0x2d   :  { %s3311_s11 = scalar_lea.vmem %s45_s26, 8192  ;;  %p3316_p6 = scmp.lt.s32.totalorder %s45_s26, %s45_s26 }
  0x2e   :  { %p3312_p5 = scmp.ne.s32.totalorder %s45_s26, %s3311_s11  ;;  %p3317_p7 = scmp.lt.s32.totalorder %s3311_s11, %s3311_s11 }
  0x30   :  { %p3318_p8 = por %p3317_p7, %p3316_p6 }
  0x32   :  { %p3319_p9 = pnand %p3318_p8, %p3312_p5 }
  0x34   :  { %3322 = shalt.err (!%p3319_p9)
}
  0x35   :  { %50 = dma.hbm_to_vmem [thread:$0]  %s3874_s2, 8192, %s45_s26, [#allocation7], %s3328_s8, %s3328_s8, %s3329_s9  }
  0x36   :  { %3323 = dma.done.wait [#allocation5], 3072  }
  0x37   :  { %3324 = vsyncadd [#allocation5], 4294964224 }
  0x38   :  { %3325 = dma.done.wait [#allocation7], 27648  }
  0x39   :  { %3326 = vsyncadd [#allocation7], 4294939648  ;;  %v91_v1 = vld [vmem:[#allocation6 + $0x8] sm:$0xff]  ;;  %v93_v3 = vld [vmem:[#allocation6 + $0x18] sm:$0xff]  ;;  %vm289_vm0 = vcmask 1043456   ;;  %vm3334_vm1 = vmmov 1  }
  0x3a   :  { %v95_v2 = vld [vmem:[#allocation6 + $0x28] sm:$0xff]  ;;  %v97_v5 = vld [vmem:[#allocation6 + $0x38] sm:$0xff]  ;;  %v90_v6 = vld [vmem:[#allocation6] sm:$0xff]  ;;  %vm264_vm3 = vcmask 359424   ;;  %vm2290_vm4 = vcmask 7168  }
  0x3b   :  { %v2352_v4 = vpack.c.bf16 %v95_v2, %v91_v1  ;;  %v94_v7 = vld [vmem:[#allocation6 + $0x20] sm:$0xff]  ;;  %v2430_v8 = vpack.c.bf16 %v97_v5, %v93_v3  ;;  %v92_v10 = vld [vmem:[#allocation6 + $0x10] sm:$0xff]  ;;  %v99_v12 = vld [vmem:[#allocation6 + $0x48] sm:$0xff] }
  0x3c   :  { %v2354_v9 = vpack.c.bf16 %v94_v7, %v90_v6  ;;  %v96_v11 = vld [vmem:[#allocation6 + $0x30] sm:$0xff]  ;;  %v103_v14 = vld [vmem:[#allocation6 + $0x68] sm:$0xff]  ;;  %v101_v15 = vld [vmem:[#allocation6 + $0x58] sm:$0xff] }
  0x3d   :  { %2353 = vmatprep.subr.bf16.mxu0 %v2352_v4  ;;  %v2432_v13 = vpack.c.bf16 %v96_v11, %v92_v10  ;;  %v105_v16 = vld [vmem:[#allocation6 + $0x78] sm:$0xff]  ;;  %2431 = vmatprep.subr.bf16.mxu1 %v2430_v8  ;;  %v2356_v17 = vpack.c.bf16 %v103_v14, %v99_v12  ;;  %v98_v19 = vld [vmem:[#allocation6 + $0x40] sm:$0xff]  ;;  %v100_v21 = vld [vmem:[#allocation6 + $0x50] sm:$0xff] }
  0x3e   :  { %2355 = vmatpush1.bf16.msra.mxu0 %v2354_v9  ;;  %v2434_v18 = vpack.c.bf16 %v105_v16, %v101_v15  ;;  %v102_v20 = vld [vmem:[#allocation6 + $0x60] sm:$0xff]  ;;  %v104_v23 = vld [vmem:[#allocation6 + $0x70] sm:$0xff]  ;;  %v107_v24 = vld [vmem:[#allocation6 + $0x88] sm:$0xff] }
  0x3f   :  { %2433 = vmatpush1.bf16.msra.mxu1 %v2432_v13  ;;  %v2358_v22 = vpack.c.bf16 %v102_v20, %v98_v19  ;;  %v111_v25 = vld [vmem:[#allocation6 + $0xa8] sm:$0xff]  ;;  %2357 = vmatprep.subr.bf16.mxu0 %v2356_v17  ;;  %v2436_v26 = vpack.c.bf16 %v104_v23, %v100_v21  ;;  %v109_v28 = vld [vmem:[#allocation6 + $0x98] sm:$0xff]  ;;  %v106_v30 = vld [vmem:[#allocation6 + $0x80] sm:$0xff] }
  0x40   :  { %2435 = vmatprep.subr.bf16.mxu1 %v2434_v18  ;;  %v2360_v27 = vpack.c.bf16 %v111_v25, %v107_v24  ;;  %v113_v29 = vld [vmem:[#allocation6 + $0xb8] sm:$0xff]  ;;  %v110_v32 = vld [vmem:[#allocation6 + $0xa0] sm:$0xff]  ;;  %v108_v33 = vld [vmem:[#allocation6 + $0x90] sm:$0xff] }
  0x41   :  { %v2438_v31 = vpack.c.bf16 %v113_v29, %v109_v28  ;;  %v112_v34 = vld [vmem:[#allocation6 + $0xb0] sm:$0xff]  ;;  %v2362_v35 = vpack.c.bf16 %v110_v32, %v106_v30  ;;  %v115_v36 = vld [vmem:[#allocation6 + $0xc8] sm:$0xff]  ;;  %v117_v38 = vld [vmem:[#allocation6 + $0xd8] sm:$0xff] }
  0x42   :  { %2359 = vmatpush1.bf16.msra.mxu0 %v2358_v22  ;;  %v119_v37 = vld [vmem:[#allocation6 + $0xe8] sm:$0xff]  ;;  %v2440_v39 = vpack.c.bf16 %v112_v34, %v108_v33  ;;  %v121_v41 = vld [vmem:[#allocation6 + $0xf8] sm:$0xff]  ;;  %v114_v42 = vld [vmem:[#allocation6 + $0xc0] sm:$0xff] }
  0x43   :  { %2437 = vmatpush1.bf16.msra.mxu1 %v2436_v26  ;;  %2361 = vmatprep.subr.bf16.mxu0 %v2360_v27  ;;  %v2364_v40 = vpack.c.bf16 %v119_v37, %v115_v36  ;;  %v118_v43 = vld [vmem:[#allocation6 + $0xe0] sm:$0xff]  ;;  %v2442_v44 = vpack.c.bf16 %v121_v41, %v117_v38  ;;  %v116_v45 = vld [vmem:[#allocation6 + $0xd0] sm:$0xff]  ;;  %v123_v47 = vld [vmem:[#allocation6 + $0x108] sm:$0xff] }
  0x44   :  { %2439 = vmatprep.subr.bf16.mxu1 %v2438_v31  ;;  %v120_v46 = vld [vmem:[#allocation6 + $0xf0] sm:$0xff]  ;;  %v127_v48 = vld [vmem:[#allocation6 + $0x128] sm:$0xff]  ;;  %v125_v49 = vld [vmem:[#allocation6 + $0x118] sm:$0xff]  ;;  %v2366_v51 = vpack.c.bf16 %v118_v43, %v114_v42 }
  0x45   :  { %v129_v50 = vld [vmem:[#allocation6 + $0x138] sm:$0xff]  ;;  %v2444_v52 = vpack.c.bf16 %v120_v46, %v116_v45  ;;  %v2368_v53 = vpack.c.bf16 %v127_v48, %v123_v47  ;;  %v122_v54 = vld [vmem:[#allocation6 + $0x100] sm:$0xff]  ;;  %v124_v56 = vld [vmem:[#allocation6 + $0x110] sm:$0xff] }
  0x46   :  { %2363 = vmatpush1.bf16.msra.mxu0 %v2362_v35  ;;  %v126_v55 = vld [vmem:[#allocation6 + $0x120] sm:$0xff]  ;;  %v2446_v57 = vpack.c.bf16 %v129_v50, %v125_v49  ;;  %v128_v58 = vld [vmem:[#allocation6 + $0x130] sm:$0xff]  ;;  %v131_v59 = vld [vmem:[#allocation6 + $0x148] sm:$0xff] }
  0x47   :  { %2441 = vmatpush1.bf16.msra.mxu1 %v2440_v39  ;;  %2365 = vmatprep.subr.bf16.mxu0 %v2364_v40  ;;  %v135_v60 = vld [vmem:[#allocation6 + $0x168] sm:$0xff]  ;;  %v133_v61 = vld [vmem:[#allocation6 + $0x158] sm:$0xff]  ;;  %v2370_v63 = vpack.c.bf16 %v126_v55, %v122_v54  ;;  %v2448_v0 = vpack.c.bf16 %v128_v58, %v124_v56  ;;  %v130_v2 = vld [vmem:[#allocation6 + $0x140] sm:$0xff] }
  0x48   :  { %2443 = vmatprep.subr.bf16.mxu1 %v2442_v44  ;;  %v137_v62 = vld [vmem:[#allocation6 + $0x178] sm:$0xff]  ;;  %v2372_v1 = vpack.c.bf16 %v135_v60, %v131_v59  ;;  %v134_v3 = vld [vmem:[#allocation6 + $0x160] sm:$0xff]  ;;  %v132_v4 = vld [vmem:[#allocation6 + $0x150] sm:$0xff] }
  0x49   :  { %v2450_v5 = vpack.c.bf16 %v137_v62, %v133_v61  ;;  %v136_v6 = vld [vmem:[#allocation6 + $0x170] sm:$0xff]  ;;  %v139_v7 = vld [vmem:[#allocation6 + $0x188] sm:$0xff]  ;;  %v141_v9 = vld [vmem:[#allocation6 + $0x198] sm:$0xff]  ;;  %v2374_v11 = vpack.c.bf16 %v134_v3, %v130_v2 }
  0x4a   :  { %2367 = vmatpush1.bf16.msra.mxu0 %v2366_v51  ;;  %v143_v8 = vld [vmem:[#allocation6 + $0x1a8] sm:$0xff]  ;;  %v145_v10 = vld [vmem:[#allocation6 + $0x1b8] sm:$0xff]  ;;  %v2452_v12 = vpack.c.bf16 %v136_v6, %v132_v4  ;;  %v138_v14 = vld [vmem:[#allocation6 + $0x180] sm:$0xff] }
  0x4b   :  { %2445 = vmatpush1.bf16.msra.mxu1 %v2444_v52  ;;  %2369 = vmatprep.subr.bf16.mxu0 %v2368_v53  ;;  %v2376_v13 = vpack.c.bf16 %v143_v8, %v139_v7  ;;  %v142_v15 = vld [vmem:[#allocation6 + $0x1a0] sm:$0xff]  ;;  %v140_v16 = vld [vmem:[#allocation6 + $0x190] sm:$0xff]  ;;  %v2454_v17 = vpack.c.bf16 %v145_v10, %v141_v9  ;;  %v147_v19 = vld [vmem:[#allocation6 + $0x1c8] sm:$0xff] }
  0x4c   :  { %2447 = vmatprep.subr.bf16.mxu1 %v2446_v57  ;;  %v144_v18 = vld [vmem:[#allocation6 + $0x1b0] sm:$0xff]  ;;  %v151_v20 = vld [vmem:[#allocation6 + $0x1e8] sm:$0xff]  ;;  %v149_v21 = vld [vmem:[#allocation6 + $0x1d8] sm:$0xff]  ;;  %v2378_v23 = vpack.c.bf16 %v142_v15, %v138_v14 }
  0x4d   :  { %v153_v22 = vld [vmem:[#allocation6 + $0x1f8] sm:$0xff]  ;;  %v2456_v24 = vpack.c.bf16 %v144_v18, %v140_v16  ;;  %v2380_v25 = vpack.c.bf16 %v151_v20, %v147_v19  ;;  %v146_v26 = vld [vmem:[#allocation6 + $0x1c0] sm:$0xff]  ;;  %v148_v28 = vld [vmem:[#allocation6 + $0x1d0] sm:$0xff] }
  0x4e   :  { %2371 = vmatpush1.bf16.msra.mxu0 %v2370_v63  ;;  %v150_v27 = vld [vmem:[#allocation6 + $0x1e0] sm:$0xff]  ;;  %v2458_v29 = vpack.c.bf16 %v153_v22, %v149_v21  ;;  %v152_v30 = vld [vmem:[#allocation6 + $0x1f0] sm:$0xff]  ;;  %v155_v31 = vld [vmem:[#allocation6 + $0x208] sm:$0xff] }
  0x4f   :  { %2449 = vmatpush1.bf16.msra.mxu1 %v2448_v0  ;;  %2373 = vmatprep.subr.bf16.mxu0 %v2372_v1  ;;  %v159_v32 = vld [vmem:[#allocation6 + $0x228] sm:$0xff]  ;;  %v157_v33 = vld [vmem:[#allocation6 + $0x218] sm:$0xff]  ;;  %v2382_v35 = vpack.c.bf16 %v150_v27, %v146_v26  ;;  %v2460_v36 = vpack.c.bf16 %v152_v30, %v148_v28  ;;  %v154_v38 = vld [vmem:[#allocation6 + $0x200] sm:$0xff] }
  0x50   :  { %2451 = vmatprep.subr.bf16.mxu1 %v2450_v5  ;;  %v161_v34 = vld [vmem:[#allocation6 + $0x238] sm:$0xff]  ;;  %v2384_v37 = vpack.c.bf16 %v159_v32, %v155_v31  ;;  %v158_v39 = vld [vmem:[#allocation6 + $0x220] sm:$0xff]  ;;  %v156_v40 = vld [vmem:[#allocation6 + $0x210] sm:$0xff] }
  0x51   :  { %v2462_v41 = vpack.c.bf16 %v161_v34, %v157_v33  ;;  %v160_v42 = vld [vmem:[#allocation6 + $0x230] sm:$0xff]  ;;  %v163_v43 = vld [vmem:[#allocation6 + $0x248] sm:$0xff]  ;;  %v165_v45 = vld [vmem:[#allocation6 + $0x258] sm:$0xff]  ;;  %v2386_v47 = vpack.c.bf16 %v158_v39, %v154_v38 }
  0x52   :  { %2375 = vmatpush1.bf16.msra.mxu0 %v2374_v11  ;;  %v167_v44 = vld [vmem:[#allocation6 + $0x268] sm:$0xff]  ;;  %v169_v46 = vld [vmem:[#allocation6 + $0x278] sm:$0xff]  ;;  %v2464_v48 = vpack.c.bf16 %v160_v42, %v156_v40  ;;  %v162_v50 = vld [vmem:[#allocation6 + $0x240] sm:$0xff] }
  0x53   :  { %2453 = vmatpush1.bf16.msra.mxu1 %v2452_v12  ;;  %2377 = vmatprep.subr.bf16.mxu0 %v2376_v13  ;;  %v2388_v49 = vpack.c.bf16 %v167_v44, %v163_v43  ;;  %v166_v51 = vld [vmem:[#allocation6 + $0x260] sm:$0xff]  ;;  %v164_v52 = vld [vmem:[#allocation6 + $0x250] sm:$0xff]  ;;  %v2466_v53 = vpack.c.bf16 %v169_v46, %v165_v45  ;;  %v171_v55 = vld [vmem:[#allocation6 + $0x288] sm:$0xff] }
  0x54   :  { %2455 = vmatprep.subr.bf16.mxu1 %v2454_v17  ;;  %v168_v54 = vld [vmem:[#allocation6 + $0x270] sm:$0xff]  ;;  %v175_v56 = vld [vmem:[#allocation6 + $0x2a8] sm:$0xff]  ;;  %v173_v57 = vld [vmem:[#allocation6 + $0x298] sm:$0xff]  ;;  %v2390_v59 = vpack.c.bf16 %v166_v51, %v162_v50 }
  0x55   :  { %v177_v58 = vld [vmem:[#allocation6 + $0x2b8] sm:$0xff]  ;;  %v2468_v60 = vpack.c.bf16 %v168_v54, %v164_v52  ;;  %v2392_v61 = vpack.c.bf16 %v175_v56, %v171_v55  ;;  %v170_v62 = vld [vmem:[#allocation6 + $0x280] sm:$0xff]  ;;  %v172_v0 = vld [vmem:[#allocation6 + $0x290] sm:$0xff] }
  0x56   :  { %2379 = vmatpush1.bf16.msra.mxu0 %v2378_v23  ;;  %v174_v63 = vld [vmem:[#allocation6 + $0x2a0] sm:$0xff]  ;;  %v2470_v1 = vpack.c.bf16 %v177_v58, %v173_v57  ;;  %v176_v2 = vld [vmem:[#allocation6 + $0x2b0] sm:$0xff]  ;;  %v179_v3 = vld [vmem:[#allocation6 + $0x2c8] sm:$0xff] }
  0x57   :  { %2457 = vmatpush1.bf16.msra.mxu1 %v2456_v24  ;;  %2381 = vmatprep.subr.bf16.mxu0 %v2380_v25  ;;  %v183_v4 = vld [vmem:[#allocation6 + $0x2e8] sm:$0xff]  ;;  %v181_v5 = vld [vmem:[#allocation6 + $0x2d8] sm:$0xff]  ;;  %v2394_v7 = vpack.c.bf16 %v174_v63, %v170_v62  ;;  %v178_v8 = vld [vmem:[#allocation6 + $0x2c0] sm:$0xff]  ;;  %v2472_v9 = vpack.c.bf16 %v176_v2, %v172_v0 }
  0x58   :  { %2459 = vmatprep.subr.bf16.mxu1 %v2458_v29  ;;  %v185_v6 = vld [vmem:[#allocation6 + $0x2f8] sm:$0xff]  ;;  %v2396_v10 = vpack.c.bf16 %v183_v4, %v179_v3  ;;  %v182_v11 = vld [vmem:[#allocation6 + $0x2e0] sm:$0xff]  ;;  %v180_v12 = vld [vmem:[#allocation6 + $0x2d0] sm:$0xff] }
  0x59   :  { %v184_v13 = vld [vmem:[#allocation6 + $0x2f0] sm:$0xff]  ;;  %v2474_v14 = vpack.c.bf16 %v185_v6, %v181_v5  ;;  %v187_v15 = vld [vmem:[#allocation6 + $0x308] sm:$0xff]  ;;  %v189_v18 = vld [vmem:[#allocation6 + $0x318] sm:$0xff]  ;;  %v2398_v20 = vpack.c.bf16 %v182_v11, %v178_v8 }
  0x5a   :  { %2383 = vmatpush1.bf16.msra.mxu0 %v2382_v35  ;;  %v191_v16 = vld [vmem:[#allocation6 + $0x328] sm:$0xff]  ;;  %v193_v19 = vld [vmem:[#allocation6 + $0x338] sm:$0xff]  ;;  %v2476_v21 = vpack.c.bf16 %v184_v13, %v180_v12  ;;  %v186_v23 = vld [vmem:[#allocation6 + $0x300] sm:$0xff] }
  0x5b   :  { %2461 = vmatpush1.bf16.msra.mxu1 %v2460_v36  ;;  %2385 = vmatprep.subr.bf16.mxu0 %v2384_v37  ;;  %v67_v17 = vld [vmem:[#allocation4 + $0x8] sm:$0xff]  ;;  %v2400_v22 = vpack.c.bf16 %v191_v16, %v187_v15  ;;  %v190_v24 = vld [vmem:[#allocation6 + $0x320] sm:$0xff]  ;;  %v188_v25 = vld [vmem:[#allocation6 + $0x310] sm:$0xff]  ;;  %v2478_v26 = vpack.c.bf16 %v193_v19, %v189_v18 }
  0x5c   :  { %2463 = vmatprep.subr.bf16.mxu1 %v2462_v41  ;;  %366 = vmatprep.mubr.f32.mxu0 %v67_v17  ;;  %v192_v27 = vld [vmem:[#allocation6 + $0x330] sm:$0xff]  ;;  %v195_v28 = vld [vmem:[#allocation6 + $0x348] sm:$0xff]  ;;  %v197_v30 = vld [vmem:[#allocation6 + $0x358] sm:$0xff]  ;;  %v2402_v32 = vpack.c.bf16 %v190_v24, %v186_v23 }
  0x5d   :  { %592 = vmatprep.mubr.f32.mxu1 %v67_v17  ;;  %v199_v29 = vld [vmem:[#allocation6 + $0x368] sm:$0xff]  ;;  %v201_v31 = vld [vmem:[#allocation6 + $0x378] sm:$0xff]  ;;  %v2480_v33 = vpack.c.bf16 %v192_v27, %v188_v25  ;;  %v194_v35 = vld [vmem:[#allocation6 + $0x340] sm:$0xff] }
  0x5e   :  { %2387 = vmatpush1.bf16.msra.mxu0 %v2386_v47  ;;  %v2404_v34 = vpack.c.bf16 %v199_v29, %v195_v28  ;;  %v198_v36 = vld [vmem:[#allocation6 + $0x360] sm:$0xff]  ;;  %v196_v37 = vld [vmem:[#allocation6 + $0x350] sm:$0xff]  ;;  %v2482_v38 = vpack.c.bf16 %v201_v31, %v197_v30  ;;  %v203_v40 = vld [vmem:[#allocation6 + $0x388] sm:$0xff] }
  0x5f   :  { %2465 = vmatpush1.bf16.msra.mxu1 %v2464_v48  ;;  %2389 = vmatprep.subr.bf16.mxu0 %v2388_v49  ;;  %v200_v39 = vld [vmem:[#allocation6 + $0x370] sm:$0xff]  ;;  %v207_v41 = vld [vmem:[#allocation6 + $0x3a8] sm:$0xff]  ;;  %v205_v42 = vld [vmem:[#allocation6 + $0x398] sm:$0xff]  ;;  %v2406_v44 = vpack.c.bf16 %v198_v36, %v194_v35 }
  0x60   :  { %2467 = vmatprep.subr.bf16.mxu1 %v2466_v53  ;;  %v209_v43 = vld [vmem:[#allocation6 + $0x3b8] sm:$0xff]  ;;  %v2484_v45 = vpack.c.bf16 %v200_v39, %v196_v37  ;;  %v2408_v46 = vpack.c.bf16 %v207_v41, %v203_v40  ;;  %v202_v47 = vld [vmem:[#allocation6 + $0x380] sm:$0xff]  ;;  %v204_v49 = vld [vmem:[#allocation6 + $0x390] sm:$0xff] }
  0x61   :  { %v206_v48 = vld [vmem:[#allocation6 + $0x3a0] sm:$0xff]  ;;  %v2486_v50 = vpack.c.bf16 %v209_v43, %v205_v42  ;;  %v208_v51 = vld [vmem:[#allocation6 + $0x3b0] sm:$0xff]  ;;  %v211_v52 = vld [vmem:[#allocation6 + $0x3c8] sm:$0xff] }
  0x62   :  { %2391 = vmatpush1.bf16.msra.mxu0 %v2390_v59  ;;  %v215_v53 = vld [vmem:[#allocation6 + $0x3e8] sm:$0xff]  ;;  %v213_v54 = vld [vmem:[#allocation6 + $0x3d8] sm:$0xff]  ;;  %v2410_v56 = vpack.c.bf16 %v206_v48, %v202_v47  ;;  %v2488_v57 = vpack.c.bf16 %v208_v51, %v204_v49  ;;  %v210_v59 = vld [vmem:[#allocation6 + $0x3c0] sm:$0xff] }
  0x63   :  { %2469 = vmatpush1.bf16.msra.mxu1 %v2468_v60  ;;  %2393 = vmatprep.subr.bf16.mxu0 %v2392_v61  ;;  %v217_v55 = vld [vmem:[#allocation6 + $0x3f8] sm:$0xff]  ;;  %v2412_v58 = vpack.c.bf16 %v215_v53, %v211_v52  ;;  %v214_v60 = vld [vmem:[#allocation6 + $0x3e0] sm:$0xff]  ;;  %v212_v61 = vld [vmem:[#allocation6 + $0x3d0] sm:$0xff] }
  0x64   :  { %2471 = vmatprep.subr.bf16.mxu1 %v2470_v1  ;;  %v2490_v62 = vpack.c.bf16 %v217_v55, %v213_v54  ;;  %v216_v63 = vld [vmem:[#allocation6 + $0x3f0] sm:$0xff]  ;;  %v219_v0 = vld [vmem:[#allocation6 + $0x408] sm:$0xff]  ;;  %v221_v2 = vld [vmem:[#allocation6 + $0x418] sm:$0xff]  ;;  %v2414_v4 = vpack.c.bf16 %v214_v60, %v210_v59 }
  0x65   :  { %v223_v1 = vld [vmem:[#allocation6 + $0x428] sm:$0xff]  ;;  %v225_v3 = vld [vmem:[#allocation6 + $0x438] sm:$0xff]  ;;  %v2492_v5 = vpack.c.bf16 %v216_v63, %v212_v61  ;;  %v222_v8 = vld [vmem:[#allocation6 + $0x420] sm:$0xff] }
  0x66   :  { %2395 = vmatpush1.bf16.msra.mxu0 %v2394_v7  ;;  %v2416_v6 = vpack.c.bf16 %v223_v1, %v219_v0  ;;  %v218_v7 = vld [vmem:[#allocation6 + $0x400] sm:$0xff]  ;;  %v231_v11 = vld [vmem:[#allocation6 + $0x468] sm:$0xff]  ;;  %v220_v12 = vld [vmem:[#allocation6 + $0x410] sm:$0xff] }
  0x67   :  { %2473 = vmatpush1.bf16.msra.mxu1 %v2472_v9  ;;  %2397 = vmatprep.subr.bf16.mxu0 %v2396_v10  ;;  %v227_v9 = vld [vmem:[#allocation6 + $0x448] sm:$0xff]  ;;  %v2494_v10 = vpack.c.bf16 %v225_v3, %v221_v2  ;;  %v224_v13 = vld [vmem:[#allocation6 + $0x430] sm:$0xff]  ;;  %v2418_v15 = vpack.c.bf16 %v222_v8, %v218_v7  ;;  %v229_v16 = vld [vmem:[#allocation6 + $0x458] sm:$0xff]  ;;  %v3335_v2 = vmov 0.0  }
  0x68   :  { %2475 = vmatprep.subr.bf16.mxu1 %v2474_v14  ;;  %v66_v14 = vld [vmem:[#allocation4] sm:$0xff]  ;;  %v233_v17 = vld [vmem:[#allocation6 + $0x478] sm:$0xff]  ;;  %v2420_v19 = vpack.c.bf16 %v231_v11, %v227_v9  ;;  %v235_v23 = vld [vmem:[#allocation6 + $0x488] sm:$0xff] }
  0x69   :  { %v70_v18 = vld [vmem:[#allocation4 + $0x20] sm:$0xff]  ;;  %v239_v24 = vld [vmem:[#allocation6 + $0x4a8] sm:$0xf]  ;;  %v2498_v25 = vpack.c.bf16 %v233_v17, %v229_v16  ;;  %v232_v27 = vld [vmem:[#allocation6 + $0x470] sm:$0xff] }
  0x6a   :  { %2399 = vmatpush1.bf16.msra.mxu0 %v2398_v20  ;;  %v226_v20 = vld [vmem:[#allocation6 + $0x440] sm:$0xff]  ;;  %v69_v28 = vld [vmem:[#allocation4 + $0x18] sm:$0xff]  ;;  %vm3417_vm2 = vmpackc.low %vm289_vm0, %vm3334_vm1 }
  0x6b   :  { %2477 = vmatpush1.bf16.msra.mxu1 %v2476_v21  ;;  %2401 = vmatprep.subr.bf16.mxu0 %v2400_v22  ;;  %v230_v21 = vld [vmem:[#allocation6 + $0x460] sm:$0xff]  ;;  %v2496_v22 = vpack.c.bf16 %v224_v13, %v220_v12  ;;  %v237_v29 = vld [vmem:[#allocation6 + $0x498] sm:$0xff]  ;;  %v240_v40 = vld [vmem:[#allocation6 + $0x4b0] sm:$0xf] }
  0x6c   :  { %2479 = vmatprep.subr.bf16.mxu1 %v2478_v26  ;;  %v228_v26 = vld [vmem:[#allocation6 + $0x450] sm:$0xff]  ;;  %v241_v30 = vld [vmem:[#allocation6 + $0x4b8] sm:$0xf]  ;;  %v234_v35 = vld [vmem:[#allocation6 + $0x480] sm:$0xff] }
  0x6d   :  { %v73_v31 = vld [vmem:[#allocation4 + $0x38] sm:$0xff]  ;;  %v238_v36 = vld [vmem:[#allocation6 + $0x4a0] sm:$0xf]  ;;  %v2500_v37 = vpack.c.bf16 %v232_v27, %v228_v26  ;;  %v2502_v39 = vpack.c.bf16 %v241_v30, %v237_v29  ;;  %v787_v41 = vld [vmem:[#allocation8 + $0x8] sm:$0xff] }
  0x6e   :  { %2403 = vmatpush1.bf16.msra.mxu0 %v2402_v32  ;;  %v2422_v32 = vpack.c.bf16 %v230_v21, %v226_v20  ;;  %v791_v42 = vld [vmem:[#allocation8 + $0x28] sm:$0xff]  ;;  %v72_v43 = vld [vmem:[#allocation4 + $0x30] sm:$0xff]  ;;  %v2427_v47 = vpack.c.bf16 %v238_v36, %v234_v35  ;;  %v78_v53 = vld [vmem:[#allocation4 + $0x60] sm:$0xff] }
  0x6f   :  { %2481 = vmatpush1.bf16.msra.mxu1 %v2480_v33  ;;  %2405 = vmatprep.subr.bf16.mxu0 %v2404_v34  ;;  %v2424_v34 = vpack.c.bf16 %v239_v24, %v235_v23  ;;  %v3423_v49 = vpack.c.bf16 %v791_v42, %v787_v41  ;;  %v75_v51 = vld [vmem:[#allocation4 + $0x48] sm:$0xff]  ;;  %v82_v54 = vld [vmem:[#allocation4 + $0x80] sm:$0xff]  ;;  %v81_v55 = vld [vmem:[#allocation4 + $0x78] sm:$0xff] }
  0x70   :  { %2483 = vmatprep.subr.bf16.mxu1 %v2482_v38  ;;  %v236_v38 = vld [vmem:[#allocation6 + $0x490] sm:$0xff]  ;;  %v79_v52 = vld [vmem:[#allocation4 + $0x68] sm:$0xff]  ;;  %v786_v60 = vld [vmem:[#allocation8] sm:$0xff] }
  0x71   :  { %v2505_v48 = vpack.c.bf16 %v240_v40, %v236_v38  ;;  %v87_v59 = vld [vmem:[#allocation4 + $0xa8] sm:$0xff]  ;;  %v790_v61 = vld [vmem:[#allocation8 + $0x20] sm:$0xff]  ;;  %v792_v63 = vld [vmem:[#allocation8 + $0x30] sm:$0xff] }
  0x72   :  { %2407 = vmatpush1.bf16.msra.mxu0 %v2406_v44  ;;  %v789_v44 = vld [vmem:[#allocation8 + $0x18] sm:$0xff]  ;;  %v795_v0 = vld [vmem:[#allocation8 + $0x48] sm:$0xff]  ;;  %v68_v3 = vld [vmem:[#allocation4 + $0x10] sm:$0xff] }
  0x73   :  { %2485 = vmatpush1.bf16.msra.mxu1 %v2484_v45  ;;  %2409 = vmatprep.subr.bf16.mxu0 %v2408_v46  ;;  %v793_v45 = vld [vmem:[#allocation8 + $0x38] sm:$0xff]  ;;  %v76_v46 = vld [vmem:[#allocation4 + $0x50] sm:$0xff]  ;;  %v799_v1 = vld [vmem:[#allocation8 + $0x68] sm:$0xff] }
  0x74   :  { %2487 = vmatprep.subr.bf16.mxu1 %v2486_v50  ;;  %v3427_v50 = vpack.c.bf16 %v793_v45, %v789_v44  ;;  %v794_v8 = vld [vmem:[#allocation8 + $0x40] sm:$0xff]  ;;  %v796_v11 = vld [vmem:[#allocation8 + $0x50] sm:$0xff]  ;;  %v71_v16 = vld [vmem:[#allocation4 + $0x28] sm:$0xff] }
  0x75   :  { %v798_v9 = vld [vmem:[#allocation8 + $0x60] sm:$0xff]  ;;  %v800_v12 = vld [vmem:[#allocation8 + $0x70] sm:$0xff]  ;;  %v811_v27 = vld [vmem:[#allocation8 + $0xc8] sm:$0xff] }
  0x76   :  { %2411 = vmatpush1.bf16.msra.mxu0 %v2410_v56  ;;  %v85_v56 = vld [vmem:[#allocation4 + $0x98] sm:$0xff]  ;;  %v3448_v17 = vpack.c.bf16 %v798_v9, %v794_v8  ;;  %v3452_v20 = vpack.c.bf16 %v800_v12, %v796_v11  ;;  %v802_v21 = vld [vmem:[#allocation8 + $0x80] sm:$0xff]  ;;  %v804_v24 = vld [vmem:[#allocation8 + $0x90] sm:$0xff] }
  0x77   :  { %2489 = vmatpush1.bf16.msra.mxu1 %v2488_v57  ;;  %2413 = vmatprep.subr.bf16.mxu0 %v2412_v58  ;;  %v84_v57 = vld [vmem:[#allocation4 + $0x90] sm:$0xff]  ;;  %v74_v29 = vld [vmem:[#allocation4 + $0x40] sm:$0xff]  ;;  %v819_v40 = vld [vmem:[#allocation8 + $0x108] sm:$0xff] }
  0x78   :  { %2491 = vmatprep.subr.bf16.mxu1 %v2490_v62  ;;  %v88_v58 = vld [vmem:[#allocation4 + $0xb0] sm:$0xff]  ;;  %v814_v35 = vld [vmem:[#allocation8 + $0xe0] sm:$0xff]  ;;  %v823_v41 = vld [vmem:[#allocation8 + $0x128] sm:$0xff] }
  0x79   :  { %v788_v62 = vld [vmem:[#allocation8 + $0x10] sm:$0xff]  ;;  %v77_v42 = vld [vmem:[#allocation4 + $0x58] sm:$0xff]  ;;  %v839_v8 = vld [vmem:[#allocation8 + $0x1a8] sm:$0xff] }
  0x7a   :  { %2415 = vmatpush1.bf16.msra.mxu0 %v2414_v4  ;;  %v3436_v4 = vpack.c.bf16 %v790_v61, %v786_v60  ;;  %v3439_v7 = vpack.c.bf16 %v792_v63, %v788_v62  ;;  %v816_v38 = vld [vmem:[#allocation8 + $0xf0] sm:$0xff]  ;;  %v821_v44 = vld [vmem:[#allocation8 + $0x118] sm:$0xff]  ;;  %v826_v62 = vld [vmem:[#allocation8 + $0x140] sm:$0xff] }
  0x7b   :  { %2493 = vmatpush1.bf16.msra.mxu1 %v2492_v5  ;;  %2417 = vmatprep.subr.bf16.mxu0 %v2416_v6  ;;  %v797_v5 = vld [vmem:[#allocation8 + $0x58] sm:$0xff]  ;;  %v830_v63 = vld [vmem:[#allocation8 + $0x160] sm:$0xff]  ;;  %v83_v9 = vld [vmem:[#allocation4 + $0x88] sm:$0xff] }
  0x7c   :  { %2495 = vmatprep.subr.bf16.mxu1 %v2494_v10  ;;  %v801_v6 = vld [vmem:[#allocation8 + $0x78] sm:$0xff]  ;;  %v3441_v10 = vpack.c.bf16 %v799_v1, %v795_v0  ;;  %v828_v1 = vld [vmem:[#allocation8 + $0x150] sm:$0xff]  ;;  %v3512_v11 = vpack.c.bf16 %v830_v63, %v826_v62 }
  0x7d   :  { %367 = vmatmul.mubr.f32.vlgmr.msra.gmra.mrb[0].mxu0 %v66_v14  ;;  %v3444_v13 = vpack.c.bf16 %v801_v6, %v797_v5  ;;  %v825_v45 = vld [vmem:[#allocation8 + $0x138] sm:$0xff]  ;;  %v835_v6 = vld [vmem:[#allocation8 + $0x188] sm:$0xff] }
  0x7e   :  { %593 = vmatmul.mubr.f32.vlgmr.msra.gmra.mrb[0].mxu1 %v66_v14  ;;  %2419 = vmatpush1.bf16.msra.mxu0 %v2418_v15  ;;  %v803_v14 = vld [vmem:[#allocation8 + $0x88] sm:$0xff]  ;;  %v833_v60 = vld [vmem:[#allocation8 + $0x178] sm:$0xff] }
  0x7f   :  { %372 = vmatprep.mubr.f32.mxu0 %v70_v18  ;;  %598 = vmatprep.mubr.f32.mxu1 %v70_v18  ;;  %v807_v15 = vld [vmem:[#allocation8 + $0xa8] sm:$0xff]  ;;  %v805_v18 = vld [vmem:[#allocation8 + $0x98] sm:$0xff] }
  0x80   :  { %2421 = vmatprep.subr.bf16.mxu0 %v2420_v19  ;;  %2497 = vmatpush1.bf16.msra.mxu1 %v2496_v22  ;;  %v809_v19 = vld [vmem:[#allocation8 + $0xb8] sm:$0xff]  ;;  %v806_v22 = vld [vmem:[#allocation8 + $0xa0] sm:$0xff]  ;;  %v3456_v23 = vpack.c.bf16 %v807_v15, %v803_v14 }
  0x81   :  { %373 = vmatmul.mubr.f32.gmra.mrb[2].mxu0 %v69_v28  ;;  %2499 = vmatprep.subr.bf16.mxu1 %v2498_v25  ;;  %v808_v25 = vld [vmem:[#allocation8 + $0xb0] sm:$0xff]  ;;  %v3460_v26 = vpack.c.bf16 %v809_v19, %v805_v18  ;;  %v3464_v30 = vpack.c.bf16 %v806_v22, %v802_v21  ;;  %v837_v12 = vld [vmem:[#allocation8 + $0x198] sm:$0xff]  ;;  %v838_v18 = vld [vmem:[#allocation8 + $0x1a0] sm:$0xff]  ;;  %v3520_v19 = vpack.c.bf16 %v839_v8, %v835_v6 }
  0x82   :  { %599 = vmatmul.mubr.f32.gmra.mrb[2].mxu1 %v69_v28  ;;  %378 = vmatprep.mubr.f32.mxu0 %v73_v31  ;;  %v815_v28 = vld [vmem:[#allocation8 + $0xe8] sm:$0xff]  ;;  %v3468_v33 = vpack.c.bf16 %v808_v25, %v804_v24  ;;  %v841_v14 = vld [vmem:[#allocation8 + $0x1b8] sm:$0xff]  ;;  %v836_v21 = vld [vmem:[#allocation8 + $0x190] sm:$0xff] }
  0x83   :  { %604 = vmatprep.mubr.f32.mxu1 %v73_v31  ;;  %2423 = vmatpush1.bf16.msra.mxu0 %v2422_v32  ;;  %v813_v31 = vld [vmem:[#allocation8 + $0xd8] sm:$0xff]  ;;  %v3472_v36 = vpack.c.bf16 %v815_v28, %v811_v27  ;;  %v840_v22 = vld [vmem:[#allocation8 + $0x1b0] sm:$0xff]  ;;  %v3524_v24 = vpack.c.bf16 %v841_v14, %v837_v12  ;;  %v843_v25 = vld [vmem:[#allocation8 + $0x1c8] sm:$0xff] }
  0x84   :  { %2426 = vmatprep.subr.msk.bf16.mxu0 %vm3417_vm2, %v2424_v34  ;;  %2501 = vmatpush1.bf16.msra.mxu1 %v2500_v37  ;;  %v817_v32 = vld [vmem:[#allocation8 + $0xf8] sm:$0xff]  ;;  %v810_v34 = vld [vmem:[#allocation8 + $0xc0] sm:$0xff]  ;;  %v812_v37 = vld [vmem:[#allocation8 + $0xd0] sm:$0xff] }
  0x85   :  { %379 = vmatmul.mubr.f32.gmra.mrb[4].mxu0 %v72_v43  ;;  %2504 = vmatprep.subr.msk.bf16.mxu1 %vm3417_vm2, %v2502_v39  ;;  %v3476_v39 = vpack.c.bf16 %v817_v32, %v813_v31  ;;  %v847_v27 = vld [vmem:[#allocation8 + $0x1e8] sm:$0xff]  ;;  %v86_v28 = vld [vmem:[#allocation4 + $0xa0] sm:$0xff]  ;;  %v845_v31 = vld [vmem:[#allocation8 + $0x1d8] sm:$0xff] }
  0x86   :  { %605 = vmatmul.mubr.f32.gmra.mrb[4].mxu1 %v72_v43  ;;  %384 = vmatprep.mubr.f32.mxu0 %v76_v46  ;;  %v3480_v43 = vpack.c.bf16 %v814_v35, %v810_v34  ;;  %v849_v32 = vld [vmem:[#allocation8 + $0x1f8] sm:$0xff]  ;;  %v3532_v34 = vpack.c.bf16 %v840_v22, %v836_v21  ;;  %v842_v35 = vld [vmem:[#allocation8 + $0x1c0] sm:$0xff] }
  0x87   :  { %610 = vmatprep.mubr.f32.mxu1 %v76_v46  ;;  %2429 = vmatpush1.bf16.msk.msra.mxu0 %vm3417_vm2, %v2427_v47  ;;  %v3484_v46 = vpack.c.bf16 %v816_v38, %v812_v37  ;;  %v818_v47 = vld [vmem:[#allocation8 + $0x100] sm:$0xff]  ;;  %v3536_v38 = vpack.c.bf16 %v847_v27, %v843_v25 }
  0x88   :  { %2507 = vmatpush1.bf16.msk.msra.mxu1 %vm3417_vm2, %v2505_v48  ;;  %2509 = vmatprep.subr.bf16.mxu0 %v3423_v49  ;;  %v822_v48 = vld [vmem:[#allocation8 + $0x120] sm:$0xff] }
  0x89   :  { %385 = vmatmul.mubr.f32.gmra.mrb[6].mxu0 %v75_v51  ;;  %2541 = vmatprep.subr.bf16.mxu1 %v3427_v50  ;;  %v846_v37 = vld [vmem:[#allocation8 + $0x1e0] sm:$0xff] }
  0x8a   :  { %611 = vmatmul.mubr.f32.gmra.mrb[6].mxu1 %v75_v51  ;;  %390 = vmatprep.mubr.f32.mxu0 %v79_v52  ;;  %v3488_v51 = vpack.c.bf16 %v823_v41, %v819_v40  ;;  %v844_v40 = vld [vmem:[#allocation8 + $0x1d0] sm:$0xff] }
  0x8b   :  { %616 = vmatprep.mubr.f32.mxu1 %v79_v52  ;;  %v820_v52 = vld [vmem:[#allocation8 + $0x110] sm:$0xff] }
  0x8c   :  { %v848_v41 = vld [vmem:[#allocation8 + $0x1f0] sm:$0xff] }
  0x8d   :  { %391 = vmatmul.mubr.f32.gmra.mrb[8].mxu0 %v78_v53 }
  0x8e   :  { %617 = vmatmul.mubr.f32.gmra.mrb[8].mxu1 %v78_v53  ;;  %396 = vmatprep.mubr.f32.mxu0 %v82_v54  ;;  %v824_v53 = vld [vmem:[#allocation8 + $0x130] sm:$0xff] }
  0x8f   :  { %622 = vmatprep.mubr.f32.mxu1 %v82_v54  ;;  %v3492_v54 = vpack.c.bf16 %v825_v45, %v821_v44  ;;  %v3500_v61 = vpack.c.bf16 %v824_v53, %v820_v52  ;;  %v89_v44 = vld [vmem:[#allocation4 + $0xb8] sm:$0xff]  ;;  %v3544_v45 = vpack.c.bf16 %v846_v37, %v842_v35 }
  0x91   :  { %397 = vmatmul.mubr.f32.gmra.mrb[10].mxu0 %v81_v55 }
  0x92   :  { %623 = vmatmul.mubr.f32.gmra.mrb[10].mxu1 %v81_v55  ;;  %402 = vmatprep.mubr.f32.mxu0 %v85_v56  ;;  %v827_v55 = vld [vmem:[#allocation8 + $0x148] sm:$0xff] }
  0x93   :  { %628 = vmatprep.mubr.f32.mxu1 %v85_v56  ;;  %v831_v56 = vld [vmem:[#allocation8 + $0x168] sm:$0xff] }
  0x94   :  { %v3504_v0 = vpack.c.bf16 %v831_v56, %v827_v55  ;;  %v242_v55 = vld [vmem:[%s3875_s3] sm:$0xf] }
  0x95   :  { %403 = vmatmul.mubr.f32.gmra.mrb[12].mxu0 %v84_v57 }
  0x96   :  { %629 = vmatmul.mubr.f32.gmra.mrb[12].mxu1 %v84_v57  ;;  %408 = vmatprep.mubr.f32.mxu0 %v88_v58  ;;  %v80_v57 = vld [vmem:[#allocation4 + $0x70] sm:$0xff] }
  0x97   :  { %634 = vmatprep.mubr.f32.mxu1 %v88_v58  ;;  %v3496_v58 = vpack.c.bf16 %v822_v48, %v818_v47  ;;  %v3548_v47 = vpack.c.bf16 %v848_v41, %v844_v40  ;;  %v244_v48 = vlaneseq }
  0x99   :  { %409 = vmatmul.mubr.f32.gmra.mrb[14].mxu0 %v87_v59  ;;  %v245_v52 = vshrl.u32 %v244_v48, 7 }
  0x9a   :  { %635 = vmatmul.mubr.f32.gmra.mrb[14].mxu1 %v87_v59  ;;  %479 = vmatprep.mubr.f32.mxu0 %v3335_v2  ;;  %v829_v59 = vld [vmem:[#allocation8 + $0x158] sm:$0xff] }
  0x9b   :  { %705 = vmatprep.mubr.f32.mxu1 %v3335_v2  ;;  %v3508_v5 = vpack.c.bf16 %v833_v60, %v829_v59  ;;  %v246_v53 = vsub.s32 0, %v245_v52  ;;  %v250_v56 = vsub.s32 1, %v245_v52  ;;  %v258_v62 = vsub.s32 3, %v245_v52 }
  0x9d   :  { %2307 = vmatmul.mubr.msk.f32.vlgmr.msra.gmra.mrb[0].mxu0 %vm264_vm3, %v68_v3  ;;  %v3602_v59 = vrot.slane %v242_v55, %v250_v56  ;;  %v3606_v14 = vrot.slane %v242_v55, %v258_v62 }
  0x9e   :  { %2317 = vmatmul.mubr.msk.f32.vlgmr.msra.gmra.mrb[0].mxu1 %vm264_vm3, %v68_v3  ;;  %2511 = vmatpush1.bf16.msra.mxu0 %v3436_v4  ;;  %v832_v3 = vld [vmem:[#allocation8 + $0x170] sm:$0xff] }
  0x9f   :  { %2543 = vmatpush1.bf16.msra.mxu1 %v3439_v7  ;;  %485 = vmatprep.mubr.f32.mxu0 %v3335_v2  ;;  %v3516_v15 = vpack.c.bf16 %v832_v3, %v828_v1 }
  0xa0   :  { %711 = vmatprep.mubr.f32.mxu1 %v3335_v2  ;;  %2513 = vmatprep.subr.bf16.mxu0 %v3441_v10 }
  0xa1   :  { %2308 = vmatmul.mubr.msk.f32.gmra.mrb[2].mxu0 %vm264_vm3, %v71_v16  ;;  %2545 = vmatprep.subr.bf16.mxu1 %v3444_v13 }
  0xa2   :  { %2318 = vmatmul.mubr.msk.f32.gmra.mrb[2].mxu1 %vm264_vm3, %v71_v16  ;;  %2515 = vmatpush1.bf16.msra.mxu0 %v3448_v17  ;;  %v834_v16 = vld [vmem:[#allocation8 + $0x180] sm:$0xff] }
  0xa3   :  { %2547 = vmatpush1.bf16.msra.mxu1 %v3452_v20  ;;  %491 = vmatprep.mubr.f32.mxu0 %v3335_v2 }
  0xa4   :  { %717 = vmatprep.mubr.f32.mxu1 %v3335_v2  ;;  %2517 = vmatprep.subr.bf16.mxu0 %v3456_v23 }
  0xa5   :  { %2309 = vmatmul.mubr.msk.f32.gmra.mrb[4].mxu0 %vm264_vm3, %v74_v29  ;;  %2549 = vmatprep.subr.bf16.mxu1 %v3460_v26 }
  0xa6   :  { %2319 = vmatmul.mubr.msk.f32.gmra.mrb[4].mxu1 %vm264_vm3, %v74_v29  ;;  %2519 = vmatpush1.bf16.msra.mxu0 %v3464_v30  ;;  %v3528_v29 = vpack.c.bf16 %v838_v18, %v834_v16  ;;  %v254_v16 = vsub.s32 2, %v245_v52 }
  0xa7   :  { %2551 = vmatpush1.bf16.msra.mxu1 %v3468_v33  ;;  %497 = vmatprep.mubr.f32.mxu0 %v3335_v2 }
  0xa8   :  { %723 = vmatprep.mubr.f32.mxu1 %v3335_v2  ;;  %2521 = vmatprep.subr.bf16.mxu0 %v3472_v36  ;;  %v3609_v21 = vrot.slane %v242_v55, %v254_v16 }
  0xa9   :  { %2310 = vmatmul.mubr.msk.f32.gmra.mrb[6].mxu0 %vm264_vm3, %v77_v42  ;;  %2553 = vmatprep.subr.bf16.mxu1 %v3476_v39 }
  0xaa   :  { %2320 = vmatmul.mubr.msk.f32.gmra.mrb[6].mxu1 %vm264_vm3, %v77_v42  ;;  %2523 = vmatpush1.bf16.msra.mxu0 %v3480_v43  ;;  %v3540_v42 = vpack.c.bf16 %v849_v32, %v845_v31 }
  0xab   :  { %2555 = vmatpush1.bf16.msra.mxu1 %v3484_v46  ;;  %503 = vmatprep.mubr.f32.mxu0 %v3335_v2 }
  0xac   :  { %729 = vmatprep.mubr.f32.mxu1 %v3335_v2  ;;  %2525 = vmatprep.subr.bf16.mxu0 %v3488_v51 }
  0xad   :  { %2311 = vmatmul.mubr.msk.f32.gmra.mrb[8].mxu0 %vm264_vm3, %v80_v57  ;;  %2557 = vmatprep.subr.bf16.mxu1 %v3492_v54 }
  0xae   :  { %2321 = vmatmul.mubr.msk.f32.gmra.mrb[8].mxu1 %vm264_vm3, %v80_v57  ;;  %2527 = vmatpush1.bf16.msra.mxu0 %v3496_v58  ;;  %v3600_v57 = vrot.slane %v242_v55, %v246_v53 }
  0xaf   :  { %2559 = vmatpush1.bf16.msra.mxu1 %v3500_v61  ;;  %509 = vmatprep.mubr.f32.mxu0 %v3335_v2 }
  0xb0   :  { %735 = vmatprep.mubr.f32.mxu1 %v3335_v2  ;;  %2529 = vmatprep.subr.bf16.mxu0 %v3504_v0 }
  0xb1   :  { %2312 = vmatmul.mubr.msk.f32.gmra.mrb[10].mxu0 %vm264_vm3, %v83_v9  ;;  %2561 = vmatprep.subr.bf16.mxu1 %v3508_v5 }
  0xb2   :  { %2322 = vmatmul.mubr.msk.f32.gmra.mrb[10].mxu1 %vm264_vm3, %v83_v9  ;;  %2531 = vmatpush1.bf16.msra.mxu0 %v3512_v11 }
  0xb3   :  { %2563 = vmatpush1.bf16.msra.mxu1 %v3516_v15  ;;  %515 = vmatprep.mubr.f32.mxu0 %v3335_v2 }
  0xb4   :  { %741 = vmatprep.mubr.f32.mxu1 %v3335_v2  ;;  %2533 = vmatprep.subr.bf16.mxu0 %v3520_v19 }
  0xb5   :  { %2313 = vmatmul.mubr.msk.f32.gmra.mrb[12].mxu0 %vm264_vm3, %v86_v28  ;;  %2565 = vmatprep.subr.bf16.mxu1 %v3524_v24 }
  0xb6   :  { %2323 = vmatmul.mubr.msk.f32.gmra.mrb[12].mxu1 %vm264_vm3, %v86_v28  ;;  %2535 = vmatpush1.bf16.msra.mxu0 %v3528_v29 }
  0xb7   :  { %2567 = vmatpush1.bf16.msra.mxu1 %v3532_v34  ;;  %521 = vmatprep.mubr.f32.mxu0 %v3335_v2 }
  0xb8   :  { %747 = vmatprep.mubr.f32.mxu1 %v3335_v2  ;;  %2537 = vmatprep.subr.bf16.mxu0 %v3536_v38 }
  0xb9   :  { %2314 = vmatmul.mubr.msk.f32.gmra.mrb[14].mxu0 %vm264_vm3, %v89_v44  ;;  %2569 = vmatprep.subr.bf16.mxu1 %v3540_v42 }
  0xba   :  { %2324 = vmatmul.mubr.msk.f32.gmra.mrb[14].mxu1 %vm264_vm3, %v89_v44  ;;  %2539 = vmatpush1.bf16.msra.mxu0 %v3544_v45 }
  0xbb   :  { %2571 = vmatpush1.bf16.msra.mxu1 %v3548_v47  ;;  %921 = vmatprep.mubr.f32.mxu0 %v3335_v2 }
  0xbc   :  { %992 = vmatprep.mubr.f32.mxu1 %v3335_v2  ;;  %2573 = vmatprep.subr.bf16.mxu0 %v3423_v49 }
  0xbd   :  { %922 = vmatmul.mubr.f32.vlgmr.msra.gmra.mrb[0].mxu0 %v3335_v2  ;;  %2605 = vmatprep.subr.bf16.mxu1 %v3427_v50 }
  0xbe   :  { %993 = vmatmul.mubr.f32.vlgmr.msra.gmra.mrb[0].mxu1 %v3335_v2  ;;  %2575 = vmatpush1.bf16.msra.mxu0 %v3436_v4 }
  0xbf   :  { %2607 = vmatpush1.bf16.msra.mxu1 %v3439_v7  ;;  %2577 = vmatprep.subr.bf16.mxu0 %v3441_v10 }
  0xc0   :  { %2609 = vmatprep.subr.bf16.mxu1 %v3444_v13  ;;  %1098 = vmatprep.mubr.f32.mxu0 %v3335_v2 }
  0xc1   :  { %1169 = vmatprep.mubr.f32.mxu1 %v3335_v2 }
  0xc2   :  { %2579 = vmatpush1.bf16.msra.mxu0 %v3448_v17 }
  0xc3   :  { %2611 = vmatpush1.bf16.msra.mxu1 %v3452_v20  ;;  %2581 = vmatprep.subr.bf16.mxu0 %v3456_v23 }
  0xc4   :  { %2613 = vmatprep.subr.bf16.mxu1 %v3460_v26 }
  0xc6   :  { %2583 = vmatpush1.bf16.msra.mxu0 %v3464_v30 }
  0xc7   :  { %2615 = vmatpush1.bf16.msra.mxu1 %v3468_v33  ;;  %2585 = vmatprep.subr.bf16.mxu0 %v3472_v36 }
  0xc8   :  { %2617 = vmatprep.subr.bf16.mxu1 %v3476_v39 }
  0xca   :  { %2587 = vmatpush1.bf16.msra.mxu0 %v3480_v43 }
  0xcb   :  { %2619 = vmatpush1.bf16.msra.mxu1 %v3484_v46  ;;  %2589 = vmatprep.subr.bf16.mxu0 %v3488_v51 }
  0xcc   :  { %2621 = vmatprep.subr.bf16.mxu1 %v3492_v54 }
  0xce   :  { %2591 = vmatpush1.bf16.msra.mxu0 %v3496_v58 }
  0xcf   :  { %2623 = vmatpush1.bf16.msra.mxu1 %v3500_v61  ;;  %2593 = vmatprep.subr.bf16.mxu0 %v3504_v0 }
  0xd0   :  { %2625 = vmatprep.subr.bf16.mxu1 %v3508_v5 }
  0xd2   :  { %2595 = vmatpush1.bf16.msra.mxu0 %v3512_v11 }
  0xd3   :  { %2627 = vmatpush1.bf16.msra.mxu1 %v3516_v15  ;;  %2597 = vmatprep.subr.bf16.mxu0 %v3520_v19 }
  0xd4   :  { %2629 = vmatprep.subr.bf16.mxu1 %v3524_v24 }
  0xd6   :  { %2599 = vmatpush1.bf16.msra.mxu0 %v3528_v29 }
  0xd7   :  { %2631 = vmatpush1.bf16.msra.mxu1 %v3532_v34  ;;  %2601 = vmatprep.subr.bf16.mxu0 %v3536_v38 }
  0xd8   :  { %2633 = vmatprep.subr.bf16.mxu1 %v3540_v42 }
  0xda   :  { %2603 = vmatpush1.bf16.msra.mxu0 %v3544_v45 }
  0xdb   :  { %2635 = vmatpush1.bf16.msra.mxu1 %v3548_v47  ;;  %2637 = vmatprep.subr.bf16.mxu0 %v3423_v49 }
  0xdc   :  { %2669 = vmatprep.subr.bf16.mxu1 %v3427_v50 }
 0x190   :  { %v923_v60 = vpop.f32.mrb[0].mxu0 }
 0x191   :  { %v3020_v63 = vadd.f32 %v923_v60, %v3600_v57  ;;  %v994_v1 = vpop.f32.mrb[0].mxu1  ;;  %v925_v3 = vpop.f32.mrb[1].mxu0 }
 0x192   :  { %v3021_v6 = vadd.f32 %v925_v3, %v3602_v59  ;;  %v996_v8 = vpop.f32.mrb[1].mxu1  ;;  %v3036_v25 = vadd.f32 %v994_v1, %v3609_v21 }
 0x193   :  { %v2325_v9 = vmul.f32 -1.442695, %v3020_v63  ;;  %v3037_v18 = vadd.f32 %v996_v8, %v3606_v14 }
 0x194   :  { %v2326_v12 = vmul.f32 -1.442695, %v3021_v6 }
 0x195   :  { %3125 = vpow2.f32 %v2325_v9  ;;  %v2327_v22 = vmul.f32 -1.442695, %v3037_v18 }
 0x196   :  { %3127 = vpow2.f32 %v2326_v12 }
 0x197   :  { %3129 = vpow2.f32 %v2327_v22 }
 0x198   :  { %3131 = vtanh.f32 %v3036_v25 }
 0x19f   :  { %v3126_v27 = vpop.eup %3125 }
 0x1a0   :  { %v3128_v28 = vpop.eup %3127  ;;  %v1006_v31 = vadd.f32 1.0, %v3126_v27 }
 0x1a1   :  { %v1012_v32 = vadd.f32 1.0, %v3128_v28  ;;  %v3130_v35 = vpop.eup %3129 }
 0x1a2   :  { %3133 = vrcp.f32 %v1006_v31  ;;  %v3132_v37 = vpop.eup %3131  ;;  %v1019_v48 = vadd.f32 1.0, %v3130_v35 }
 0x1a3   :  { %3135 = vrcp.f32 %v1012_v32 }
 0x1a4   :  { %3137 = vrcp.f32 %v1019_v48 }
 0x1ac   :  { %v3134_v40 = vpop.eup %3133 }
 0x1ad   :  { %v3136_v41 = vpop.eup %3135  ;;  %v1023_v44 = vmul.f32 %v3134_v40, %v3132_v37 }
 0x1ae   :  { %v1022_v52 = vmul.f32 0.0, %v3136_v41  ;;  %v3138_v55 = vpop.eup %3137 }
 0x1b0   :  { %v3612_v53 = vadd.f32 %v1023_v44, %v1022_v52 }
 0x1b2   :  { %3139 = vtanh.f32 %v3612_v53 }
 0x1bc   :  { %v3140_v56 = vpop.eup %3139 }
 0x1bd   :  { %v1026_v60 = vmul.f32 %v3140_v56, %v3138_v55 }
 0x1bf   :  { %1099 = vmatmul.mubr.f32.vlgmr.msra.gmra.mrb[2].mxu0 %v1026_v60  ;;  %1170 = vmatmul.mubr.f32.vlgmr.msra.gmra.mrb[2].mxu1 %v1026_v60 }
 0x1c0   :  { %2639 = vmatpush1.bf16.msra.mxu0 %v3436_v4  ;;  %2671 = vmatpush1.bf16.msra.mxu1 %v3439_v7 }
 0x1c1   :  { %2641 = vmatprep.subr.bf16.mxu0 %v3441_v10  ;;  %2673 = vmatprep.subr.bf16.mxu1 %v3444_v13 }
 0x1c2   :  { %1275 = vmatprep.mubr.f32.mxu0 %v3335_v2  ;;  %1346 = vmatprep.mubr.f32.mxu1 %v3335_v2 }
 0x1c4   :  { %2643 = vmatpush1.bf16.msra.mxu0 %v3448_v17  ;;  %2675 = vmatpush1.bf16.msra.mxu1 %v3452_v20 }
 0x1c5   :  { %2645 = vmatprep.subr.bf16.mxu0 %v3456_v23  ;;  %2677 = vmatprep.subr.bf16.mxu1 %v3460_v26 }
 0x1c8   :  { %2647 = vmatpush1.bf16.msra.mxu0 %v3464_v30  ;;  %2679 = vmatpush1.bf16.msra.mxu1 %v3468_v33 }
 0x1c9   :  { %2649 = vmatprep.subr.bf16.mxu0 %v3472_v36  ;;  %2681 = vmatprep.subr.bf16.mxu1 %v3476_v39 }
 0x1cc   :  { %2651 = vmatpush1.bf16.msra.mxu0 %v3480_v43  ;;  %2683 = vmatpush1.bf16.msra.mxu1 %v3484_v46 }
 0x1cd   :  { %2653 = vmatprep.subr.bf16.mxu0 %v3488_v51  ;;  %2685 = vmatprep.subr.bf16.mxu1 %v3492_v54 }
 0x1d0   :  { %2655 = vmatpush1.bf16.msra.mxu0 %v3496_v58  ;;  %2687 = vmatpush1.bf16.msra.mxu1 %v3500_v61 }
 0x1d1   :  { %2657 = vmatprep.subr.bf16.mxu0 %v3504_v0  ;;  %2689 = vmatprep.subr.bf16.mxu1 %v3508_v5 }
 0x1d4   :  { %2659 = vmatpush1.bf16.msra.mxu0 %v3512_v11  ;;  %2691 = vmatpush1.bf16.msra.mxu1 %v3516_v15 }
 0x1d5   :  { %2661 = vmatprep.subr.bf16.mxu0 %v3520_v19  ;;  %2693 = vmatprep.subr.bf16.mxu1 %v3524_v24 }
 0x1d8   :  { %2663 = vmatpush1.bf16.msra.mxu0 %v3528_v29  ;;  %2695 = vmatpush1.bf16.msra.mxu1 %v3532_v34 }
 0x1d9   :  { %2665 = vmatprep.subr.bf16.mxu0 %v3536_v38  ;;  %2697 = vmatprep.subr.bf16.mxu1 %v3540_v42 }
 0x1dc   :  { %2667 = vmatpush1.bf16.msra.mxu0 %v3544_v45  ;;  %2699 = vmatpush1.bf16.msra.mxu1 %v3548_v47 }
 0x1dd   :  { %2701 = vmatprep.subr.bf16.mxu0 %v3423_v49  ;;  %2733 = vmatprep.subr.bf16.mxu1 %v3427_v50 }
 0x292   :  { %v1100_v62 = vpop.f32.mrb[2].mxu0  ;;  %v1171_v63 = vpop.f32.mrb[2].mxu1 }
 0x293   :  { %v3022_v1 = vadd.f32 %v1100_v62, %v3600_v57  ;;  %v1102_v3 = vpop.f32.mrb[3].mxu0  ;;  %v1173_v6 = vpop.f32.mrb[3].mxu1  ;;  %v3038_v22 = vadd.f32 %v1171_v63, %v3609_v21 }
 0x294   :  { %v3023_v8 = vadd.f32 %v1102_v3, %v3602_v59  ;;  %v3039_v16 = vadd.f32 %v1173_v6, %v3606_v14 }
 0x295   :  { %v2328_v9 = vmul.f32 -1.442695, %v3022_v1 }
 0x296   :  { %v2329_v12 = vmul.f32 -1.442695, %v3023_v8  ;;  %v2330_v18 = vmul.f32 -1.442695, %v3039_v16 }
 0x297   :  { %3141 = vpow2.f32 %v2328_v9 }
 0x298   :  { %3143 = vpow2.f32 %v2329_v12 }
 0x299   :  { %3145 = vpow2.f32 %v2330_v18 }
 0x29a   :  { %3147 = vtanh.f32 %v3038_v22 }
 0x2a1   :  { %v3142_v25 = vpop.eup %3141 }
 0x2a2   :  { %v3144_v27 = vpop.eup %3143  ;;  %v1183_v28 = vadd.f32 1.0, %v3142_v25 }
 0x2a3   :  { %v1189_v31 = vadd.f32 1.0, %v3144_v27  ;;  %v3146_v32 = vpop.eup %3145 }
 0x2a4   :  { %3149 = vrcp.f32 %v1183_v28  ;;  %v3148_v35 = vpop.eup %3147  ;;  %v1196_v44 = vadd.f32 1.0, %v3146_v32 }
 0x2a5   :  { %3151 = vrcp.f32 %v1189_v31 }
 0x2a6   :  { %3153 = vrcp.f32 %v1196_v44 }
 0x2ae   :  { %v3150_v37 = vpop.eup %3149 }
 0x2af   :  { %v3152_v40 = vpop.eup %3151  ;;  %v1200_v41 = vmul.f32 %v3150_v37, %v3148_v35 }
 0x2b0   :  { %v1199_v48 = vmul.f32 %v3152_v40, %v3612_v53  ;;  %v3154_v55 = vpop.eup %3153 }
 0x2b2   :  { %v3654_v52 = vadd.f32 %v1200_v41, %v1199_v48 }
 0x2b4   :  { %3155 = vtanh.f32 %v3654_v52 }
 0x2be   :  { %v3156_v56 = vpop.eup %3155 }
 0x2bf   :  { %v1203_v60 = vmul.f32 %v3156_v56, %v3154_v55 }
 0x2c1   :  { %1276 = vmatmul.mubr.f32.vlgmr.msra.gmra.mrb[4].mxu0 %v1203_v60  ;;  %1347 = vmatmul.mubr.f32.vlgmr.msra.gmra.mrb[4].mxu1 %v1203_v60 }
 0x2c2   :  { %2703 = vmatpush1.bf16.msra.mxu0 %v3436_v4  ;;  %2735 = vmatpush1.bf16.msra.mxu1 %v3439_v7 }
 0x2c3   :  { %2705 = vmatprep.subr.bf16.mxu0 %v3441_v10  ;;  %2737 = vmatprep.subr.bf16.mxu1 %v3444_v13 }
 0x2c4   :  { %1452 = vmatprep.mubr.f32.mxu0 %v3335_v2  ;;  %1523 = vmatprep.mubr.f32.mxu1 %v3335_v2 }
 0x2c6   :  { %2707 = vmatpush1.bf16.msra.mxu0 %v3448_v17  ;;  %2739 = vmatpush1.bf16.msra.mxu1 %v3452_v20 }
 0x2c7   :  { %2709 = vmatprep.subr.bf16.mxu0 %v3456_v23  ;;  %2741 = vmatprep.subr.bf16.mxu1 %v3460_v26 }
 0x2ca   :  { %2711 = vmatpush1.bf16.msra.mxu0 %v3464_v30  ;;  %2743 = vmatpush1.bf16.msra.mxu1 %v3468_v33 }
 0x2cb   :  { %2713 = vmatprep.subr.bf16.mxu0 %v3472_v36  ;;  %2745 = vmatprep.subr.bf16.mxu1 %v3476_v39 }
 0x2ce   :  { %2715 = vmatpush1.bf16.msra.mxu0 %v3480_v43  ;;  %2747 = vmatpush1.bf16.msra.mxu1 %v3484_v46 }
 0x2cf   :  { %2717 = vmatprep.subr.bf16.mxu0 %v3488_v51  ;;  %2749 = vmatprep.subr.bf16.mxu1 %v3492_v54 }
 0x2d2   :  { %2719 = vmatpush1.bf16.msra.mxu0 %v3496_v58  ;;  %2751 = vmatpush1.bf16.msra.mxu1 %v3500_v61 }
 0x2d3   :  { %2721 = vmatprep.subr.bf16.mxu0 %v3504_v0  ;;  %2753 = vmatprep.subr.bf16.mxu1 %v3508_v5 }
 0x2d6   :  { %2723 = vmatpush1.bf16.msra.mxu0 %v3512_v11  ;;  %2755 = vmatpush1.bf16.msra.mxu1 %v3516_v15 }
 0x2d7   :  { %2725 = vmatprep.subr.bf16.mxu0 %v3520_v19  ;;  %2757 = vmatprep.subr.bf16.mxu1 %v3524_v24 }
 0x2da   :  { %2727 = vmatpush1.bf16.msra.mxu0 %v3528_v29  ;;  %2759 = vmatpush1.bf16.msra.mxu1 %v3532_v34 }
 0x2db   :  { %2729 = vmatprep.subr.bf16.mxu0 %v3536_v38  ;;  %2761 = vmatprep.subr.bf16.mxu1 %v3540_v42 }
 0x2de   :  { %2731 = vmatpush1.bf16.msra.mxu0 %v3544_v45  ;;  %2763 = vmatpush1.bf16.msra.mxu1 %v3548_v47 }
 0x2df   :  { %2765 = vmatprep.subr.bf16.mxu0 %v3423_v49  ;;  %2797 = vmatprep.subr.bf16.mxu1 %v3427_v50 }
 0x394   :  { %v1277_v53 = vpop.f32.mrb[4].mxu0  ;;  %v1348_v62 = vpop.f32.mrb[4].mxu1 }
 0x395   :  { %v3024_v63 = vadd.f32 %v1277_v53, %v3600_v57  ;;  %v1279_v1 = vpop.f32.mrb[5].mxu0  ;;  %v1350_v3 = vpop.f32.mrb[5].mxu1  ;;  %v3040_v18 = vadd.f32 %v1348_v62, %v3609_v21 }
 0x396   :  { %v3025_v6 = vadd.f32 %v1279_v1, %v3602_v59  ;;  %v3041_v12 = vadd.f32 %v1350_v3, %v3606_v14 }
 0x397   :  { %v2331_v8 = vmul.f32 -1.442695, %v3024_v63 }
 0x398   :  { %v2332_v9 = vmul.f32 -1.442695, %v3025_v6  ;;  %v2333_v16 = vmul.f32 -1.442695, %v3041_v12 }
 0x399   :  { %3157 = vpow2.f32 %v2331_v8 }
 0x39a   :  { %3159 = vpow2.f32 %v2332_v9 }
 0x39b   :  { %3161 = vpow2.f32 %v2333_v16 }
 0x39c   :  { %3163 = vtanh.f32 %v3040_v18 }
 0x3a3   :  { %v3158_v22 = vpop.eup %3157 }
 0x3a4   :  { %v3160_v25 = vpop.eup %3159  ;;  %v1360_v27 = vadd.f32 1.0, %v3158_v22 }
 0x3a5   :  { %v1366_v28 = vadd.f32 1.0, %v3160_v25  ;;  %v3162_v31 = vpop.eup %3161 }
 0x3a6   :  { %3165 = vrcp.f32 %v1360_v27  ;;  %v3164_v32 = vpop.eup %3163  ;;  %v1373_v41 = vadd.f32 1.0, %v3162_v31 }
 0x3a7   :  { %3167 = vrcp.f32 %v1366_v28 }
 0x3a8   :  { %3169 = vrcp.f32 %v1373_v41 }
 0x3b0   :  { %v3166_v35 = vpop.eup %3165 }
 0x3b1   :  { %v3168_v37 = vpop.eup %3167  ;;  %v1377_v40 = vmul.f32 %v3166_v35, %v3164_v32 }
 0x3b2   :  { %v1376_v44 = vmul.f32 %v3168_v37, %v3654_v52  ;;  %v3170_v55 = vpop.eup %3169 }
 0x3b4   :  { %v3696_v48 = vadd.f32 %v1377_v40, %v1376_v44 }
 0x3b6   :  { %3171 = vtanh.f32 %v3696_v48 }
 0x3c0   :  { %v3172_v56 = vpop.eup %3171 }
 0x3c1   :  { %v1380_v60 = vmul.f32 %v3172_v56, %v3170_v55 }
 0x3c3   :  { %1453 = vmatmul.mubr.f32.vlgmr.msra.gmra.mrb[6].mxu0 %v1380_v60  ;;  %1524 = vmatmul.mubr.f32.vlgmr.msra.gmra.mrb[6].mxu1 %v1380_v60 }
 0x3c4   :  { %2767 = vmatpush1.bf16.msra.mxu0 %v3436_v4  ;;  %2799 = vmatpush1.bf16.msra.mxu1 %v3439_v7 }
 0x3c5   :  { %2769 = vmatprep.subr.bf16.mxu0 %v3441_v10  ;;  %2801 = vmatprep.subr.bf16.mxu1 %v3444_v13 }
 0x3c6   :  { %1629 = vmatprep.mubr.f32.mxu0 %v3335_v2  ;;  %1700 = vmatprep.mubr.f32.mxu1 %v3335_v2 }
 0x3c8   :  { %2771 = vmatpush1.bf16.msra.mxu0 %v3448_v17  ;;  %2803 = vmatpush1.bf16.msra.mxu1 %v3452_v20 }
 0x3c9   :  { %2773 = vmatprep.subr.bf16.mxu0 %v3456_v23  ;;  %2805 = vmatprep.subr.bf16.mxu1 %v3460_v26 }
 0x3cc   :  { %2775 = vmatpush1.bf16.msra.mxu0 %v3464_v30  ;;  %2807 = vmatpush1.bf16.msra.mxu1 %v3468_v33 }
 0x3cd   :  { %2777 = vmatprep.subr.bf16.mxu0 %v3472_v36  ;;  %2809 = vmatprep.subr.bf16.mxu1 %v3476_v39 }
 0x3d0   :  { %2779 = vmatpush1.bf16.msra.mxu0 %v3480_v43  ;;  %2811 = vmatpush1.bf16.msra.mxu1 %v3484_v46 }
 0x3d1   :  { %2781 = vmatprep.subr.bf16.mxu0 %v3488_v51  ;;  %2813 = vmatprep.subr.bf16.mxu1 %v3492_v54 }
 0x3d4   :  { %2783 = vmatpush1.bf16.msra.mxu0 %v3496_v58  ;;  %2815 = vmatpush1.bf16.msra.mxu1 %v3500_v61 }
 0x3d5   :  { %2785 = vmatprep.subr.bf16.mxu0 %v3504_v0  ;;  %2817 = vmatprep.subr.bf16.mxu1 %v3508_v5 }
 0x3d8   :  { %2787 = vmatpush1.bf16.msra.mxu0 %v3512_v11  ;;  %2819 = vmatpush1.bf16.msra.mxu1 %v3516_v15 }
 0x3d9   :  { %2789 = vmatprep.subr.bf16.mxu0 %v3520_v19  ;;  %2821 = vmatprep.subr.bf16.mxu1 %v3524_v24 }
 0x3dc   :  { %2791 = vmatpush1.bf16.msra.mxu0 %v3528_v29  ;;  %2823 = vmatpush1.bf16.msra.mxu1 %v3532_v34 }
 0x3dd   :  { %2793 = vmatprep.subr.bf16.mxu0 %v3536_v38  ;;  %2825 = vmatprep.subr.bf16.mxu1 %v3540_v42 }
 0x3e0   :  { %2795 = vmatpush1.bf16.msra.mxu0 %v3544_v45  ;;  %2827 = vmatpush1.bf16.msra.mxu1 %v3548_v47 }
 0x3e1   :  { %2829 = vmatprep.subr.bf16.mxu0 %v3423_v49  ;;  %2861 = vmatprep.subr.bf16.mxu1 %v3427_v50 }
 0x496   :  { %v1454_v52 = vpop.f32.mrb[6].mxu0  ;;  %v1525_v53 = vpop.f32.mrb[6].mxu1 }
 0x497   :  { %v3026_v62 = vadd.f32 %v1454_v52, %v3600_v57  ;;  %v1456_v63 = vpop.f32.mrb[7].mxu0  ;;  %v1527_v1 = vpop.f32.mrb[7].mxu1  ;;  %v3042_v16 = vadd.f32 %v1525_v53, %v3609_v21 }
 0x498   :  { %v3027_v3 = vadd.f32 %v1456_v63, %v3602_v59  ;;  %v3043_v9 = vadd.f32 %v1527_v1, %v3606_v14 }
 0x499   :  { %v2334_v6 = vmul.f32 -1.442695, %v3026_v62 }
 0x49a   :  { %v2335_v8 = vmul.f32 -1.442695, %v3027_v3  ;;  %v2336_v12 = vmul.f32 -1.442695, %v3043_v9 }
 0x49b   :  { %3173 = vpow2.f32 %v2334_v6 }
 0x49c   :  { %3175 = vpow2.f32 %v2335_v8 }
 0x49d   :  { %3177 = vpow2.f32 %v2336_v12 }
 0x49e   :  { %3179 = vtanh.f32 %v3042_v16 }
 0x4a5   :  { %v3174_v18 = vpop.eup %3173 }
 0x4a6   :  { %v3176_v22 = vpop.eup %3175  ;;  %v1537_v25 = vadd.f32 1.0, %v3174_v18 }
 0x4a7   :  { %v1543_v27 = vadd.f32 1.0, %v3176_v22  ;;  %v3178_v28 = vpop.eup %3177 }
 0x4a8   :  { %3181 = vrcp.f32 %v1537_v25  ;;  %v3180_v31 = vpop.eup %3179  ;;  %v1550_v40 = vadd.f32 1.0, %v3178_v28 }
 0x4a9   :  { %3183 = vrcp.f32 %v1543_v27 }
 0x4aa   :  { %3185 = vrcp.f32 %v1550_v40 }
 0x4b2   :  { %v3182_v32 = vpop.eup %3181 }
 0x4b3   :  { %v3184_v35 = vpop.eup %3183  ;;  %v1554_v37 = vmul.f32 %v3182_v32, %v3180_v31 }
 0x4b4   :  { %v1553_v41 = vmul.f32 %v3184_v35, %v3696_v48  ;;  %v3186_v55 = vpop.eup %3185 }
 0x4b6   :  { %v3738_v44 = vadd.f32 %v1554_v37, %v1553_v41 }
 0x4b8   :  { %3187 = vtanh.f32 %v3738_v44 }
 0x4c2   :  { %v3188_v56 = vpop.eup %3187 }
 0x4c3   :  { %v1557_v60 = vmul.f32 %v3188_v56, %v3186_v55 }
 0x4c5   :  { %1630 = vmatmul.mubr.f32.vlgmr.msra.gmra.mrb[8].mxu0 %v1557_v60  ;;  %1701 = vmatmul.mubr.f32.vlgmr.msra.gmra.mrb[8].mxu1 %v1557_v60 }
 0x4c6   :  { %2831 = vmatpush1.bf16.msra.mxu0 %v3436_v4  ;;  %2863 = vmatpush1.bf16.msra.mxu1 %v3439_v7 }
 0x4c7   :  { %2833 = vmatprep.subr.bf16.mxu0 %v3441_v10  ;;  %2865 = vmatprep.subr.bf16.mxu1 %v3444_v13 }
 0x4c8   :  { %1806 = vmatprep.mubr.f32.mxu0 %v3335_v2  ;;  %1877 = vmatprep.mubr.f32.mxu1 %v3335_v2 }
 0x4ca   :  { %2835 = vmatpush1.bf16.msra.mxu0 %v3448_v17  ;;  %2867 = vmatpush1.bf16.msra.mxu1 %v3452_v20 }
 0x4cb   :  { %2837 = vmatprep.subr.bf16.mxu0 %v3456_v23  ;;  %2869 = vmatprep.subr.bf16.mxu1 %v3460_v26 }
 0x4ce   :  { %2839 = vmatpush1.bf16.msra.mxu0 %v3464_v30  ;;  %2871 = vmatpush1.bf16.msra.mxu1 %v3468_v33 }
 0x4cf   :  { %2841 = vmatprep.subr.bf16.mxu0 %v3472_v36  ;;  %2873 = vmatprep.subr.bf16.mxu1 %v3476_v39 }
 0x4d2   :  { %2843 = vmatpush1.bf16.msra.mxu0 %v3480_v43  ;;  %2875 = vmatpush1.bf16.msra.mxu1 %v3484_v46 }
 0x4d3   :  { %2845 = vmatprep.subr.bf16.mxu0 %v3488_v51  ;;  %2877 = vmatprep.subr.bf16.mxu1 %v3492_v54 }
 0x4d6   :  { %2847 = vmatpush1.bf16.msra.mxu0 %v3496_v58  ;;  %2879 = vmatpush1.bf16.msra.mxu1 %v3500_v61 }
 0x4d7   :  { %2849 = vmatprep.subr.bf16.mxu0 %v3504_v0  ;;  %2881 = vmatprep.subr.bf16.mxu1 %v3508_v5 }
 0x4da   :  { %2851 = vmatpush1.bf16.msra.mxu0 %v3512_v11  ;;  %2883 = vmatpush1.bf16.msra.mxu1 %v3516_v15 }
 0x4db   :  { %2853 = vmatprep.subr.bf16.mxu0 %v3520_v19  ;;  %2885 = vmatprep.subr.bf16.mxu1 %v3524_v24 }
 0x4de   :  { %2855 = vmatpush1.bf16.msra.mxu0 %v3528_v29  ;;  %2887 = vmatpush1.bf16.msra.mxu1 %v3532_v34 }
 0x4df   :  { %2857 = vmatprep.subr.bf16.mxu0 %v3536_v38  ;;  %2889 = vmatprep.subr.bf16.mxu1 %v3540_v42 }
 0x4e2   :  { %2859 = vmatpush1.bf16.msra.mxu0 %v3544_v45  ;;  %2891 = vmatpush1.bf16.msra.mxu1 %v3548_v47 }
 0x4e3   :  { %2893 = vmatprep.subr.bf16.mxu0 %v3423_v49  ;;  %2925 = vmatprep.subr.bf16.mxu1 %v3427_v50 }
 0x598   :  { %v1631_v48 = vpop.f32.mrb[8].mxu0  ;;  %v1702_v52 = vpop.f32.mrb[8].mxu1 }
 0x599   :  { %v3028_v53 = vadd.f32 %v1631_v48, %v3600_v57  ;;  %v1633_v62 = vpop.f32.mrb[9].mxu0  ;;  %v1704_v63 = vpop.f32.mrb[9].mxu1  ;;  %v3044_v12 = vadd.f32 %v1702_v52, %v3609_v21 }
 0x59a   :  { %v3029_v1 = vadd.f32 %v1633_v62, %v3602_v59  ;;  %v3045_v8 = vadd.f32 %v1704_v63, %v3606_v14 }
 0x59b   :  { %v2337_v3 = vmul.f32 -1.442695, %v3028_v53 }
 0x59c   :  { %v2338_v6 = vmul.f32 -1.442695, %v3029_v1  ;;  %v2339_v9 = vmul.f32 -1.442695, %v3045_v8 }
 0x59d   :  { %3189 = vpow2.f32 %v2337_v3 }
 0x59e   :  { %3191 = vpow2.f32 %v2338_v6 }
 0x59f   :  { %3193 = vpow2.f32 %v2339_v9 }
 0x5a0   :  { %3195 = vtanh.f32 %v3044_v12 }
 0x5a7   :  { %v3190_v16 = vpop.eup %3189 }
 0x5a8   :  { %v3192_v18 = vpop.eup %3191  ;;  %v1714_v22 = vadd.f32 1.0, %v3190_v16 }
 0x5a9   :  { %v1720_v25 = vadd.f32 1.0, %v3192_v18  ;;  %v3194_v27 = vpop.eup %3193 }
 0x5aa   :  { %3197 = vrcp.f32 %v1714_v22  ;;  %v3196_v28 = vpop.eup %3195  ;;  %v1727_v37 = vadd.f32 1.0, %v3194_v27 }
 0x5ab   :  { %3199 = vrcp.f32 %v1720_v25 }
 0x5ac   :  { %3201 = vrcp.f32 %v1727_v37 }
 0x5b4   :  { %v3198_v31 = vpop.eup %3197 }
 0x5b5   :  { %v3200_v32 = vpop.eup %3199  ;;  %v1731_v35 = vmul.f32 %v3198_v31, %v3196_v28 }
 0x5b6   :  { %v1730_v40 = vmul.f32 %v3200_v32, %v3738_v44  ;;  %v3202_v55 = vpop.eup %3201 }
 0x5b8   :  { %v3780_v41 = vadd.f32 %v1731_v35, %v1730_v40 }
 0x5ba   :  { %3203 = vtanh.f32 %v3780_v41 }
 0x5c4   :  { %v3204_v56 = vpop.eup %3203 }
 0x5c5   :  { %v1734_v60 = vmul.f32 %v3204_v56, %v3202_v55 }
 0x5c7   :  { %1807 = vmatmul.mubr.f32.vlgmr.msra.gmra.mrb[10].mxu0 %v1734_v60  ;;  %1878 = vmatmul.mubr.f32.vlgmr.msra.gmra.mrb[10].mxu1 %v1734_v60 }
 0x5c8   :  { %2895 = vmatpush1.bf16.msra.mxu0 %v3436_v4  ;;  %2927 = vmatpush1.bf16.msra.mxu1 %v3439_v7 }
 0x5c9   :  { %2897 = vmatprep.subr.bf16.mxu0 %v3441_v10  ;;  %2929 = vmatprep.subr.bf16.mxu1 %v3444_v13 }
 0x5ca   :  { %1983 = vmatprep.mubr.f32.mxu0 %v3335_v2  ;;  %2054 = vmatprep.mubr.f32.mxu1 %v3335_v2 }
 0x5cc   :  { %2899 = vmatpush1.bf16.msra.mxu0 %v3448_v17  ;;  %2931 = vmatpush1.bf16.msra.mxu1 %v3452_v20 }
 0x5cd   :  { %2901 = vmatprep.subr.bf16.mxu0 %v3456_v23  ;;  %2933 = vmatprep.subr.bf16.mxu1 %v3460_v26 }
 0x5d0   :  { %2903 = vmatpush1.bf16.msra.mxu0 %v3464_v30  ;;  %2935 = vmatpush1.bf16.msra.mxu1 %v3468_v33 }
 0x5d1   :  { %2905 = vmatprep.subr.bf16.mxu0 %v3472_v36  ;;  %2937 = vmatprep.subr.bf16.mxu1 %v3476_v39 }
 0x5d4   :  { %2907 = vmatpush1.bf16.msra.mxu0 %v3480_v43  ;;  %2939 = vmatpush1.bf16.msra.mxu1 %v3484_v46 }
 0x5d5   :  { %2909 = vmatprep.subr.bf16.mxu0 %v3488_v51  ;;  %2941 = vmatprep.subr.bf16.mxu1 %v3492_v54 }
 0x5d8   :  { %2911 = vmatpush1.bf16.msra.mxu0 %v3496_v58  ;;  %2943 = vmatpush1.bf16.msra.mxu1 %v3500_v61 }
 0x5d9   :  { %2913 = vmatprep.subr.bf16.mxu0 %v3504_v0  ;;  %2945 = vmatprep.subr.bf16.mxu1 %v3508_v5 }
 0x5dc   :  { %2915 = vmatpush1.bf16.msra.mxu0 %v3512_v11  ;;  %2947 = vmatpush1.bf16.msra.mxu1 %v3516_v15 }
 0x5dd   :  { %2917 = vmatprep.subr.bf16.mxu0 %v3520_v19  ;;  %2949 = vmatprep.subr.bf16.mxu1 %v3524_v24 }
 0x5e0   :  { %2919 = vmatpush1.bf16.msra.mxu0 %v3528_v29  ;;  %2951 = vmatpush1.bf16.msra.mxu1 %v3532_v34 }
 0x5e1   :  { %2921 = vmatprep.subr.bf16.mxu0 %v3536_v38  ;;  %2953 = vmatprep.subr.bf16.mxu1 %v3540_v42 }
 0x5e4   :  { %2923 = vmatpush1.bf16.msra.mxu0 %v3544_v45  ;;  %2955 = vmatpush1.bf16.msra.mxu1 %v3548_v47 }
 0x5e5   :  { %2957 = vmatprep.subr.bf16.mxu0 %v3423_v49  ;;  %2989 = vmatprep.subr.bf16.mxu1 %v3427_v50 }
 0x69a   :  { %v1808_v44 = vpop.f32.mrb[10].mxu0  ;;  %v1879_v48 = vpop.f32.mrb[10].mxu1 }
 0x69b   :  { %v3030_v52 = vadd.f32 %v1808_v44, %v3600_v57  ;;  %v1810_v53 = vpop.f32.mrb[11].mxu0  ;;  %v1881_v62 = vpop.f32.mrb[11].mxu1  ;;  %v3046_v9 = vadd.f32 %v1879_v48, %v3609_v21 }
 0x69c   :  { %v3031_v63 = vadd.f32 %v1810_v53, %v3602_v59  ;;  %v3047_v6 = vadd.f32 %v1881_v62, %v3606_v14 }
 0x69d   :  { %v2340_v1 = vmul.f32 -1.442695, %v3030_v52 }
 0x69e   :  { %v2341_v3 = vmul.f32 -1.442695, %v3031_v63  ;;  %v2342_v8 = vmul.f32 -1.442695, %v3047_v6 }
 0x69f   :  { %3205 = vpow2.f32 %v2340_v1 }
 0x6a0   :  { %3207 = vpow2.f32 %v2341_v3 }
 0x6a1   :  { %3209 = vpow2.f32 %v2342_v8 }
 0x6a2   :  { %3211 = vtanh.f32 %v3046_v9 }
 0x6a9   :  { %v3206_v49 = vpop.eup %3205 }
 0x6aa   :  { %v3208_v12 = vpop.eup %3207  ;;  %v1891_v50 = vadd.f32 1.0, %v3206_v49 }
 0x6ab   :  { %v1897_v16 = vadd.f32 1.0, %v3208_v12  ;;  %v3210_v18 = vpop.eup %3209 }
 0x6ac   :  { %3213 = vrcp.f32 %v1891_v50  ;;  %v3212_v22 = vpop.eup %3211  ;;  %v1904_v31 = vadd.f32 1.0, %v3210_v18  ;;  %v2349_v50 = vld [vmem:[%s3876_s4] ss:$0 sm:$0xff] }
 0x6ad   :  { %3215 = vrcp.f32 %v1897_v16 }
 0x6ae   :  { %3217 = vrcp.f32 %v1904_v31 }
 0x6b6   :  { %v3214_v25 = vpop.eup %3213 }
 0x6b7   :  { %v3216_v27 = vpop.eup %3215  ;;  %v1908_v28 = vmul.f32 %v3214_v25, %v3212_v22  ;;  %v2350_v22 = vld [vmem:[#allocation3] ss:$0 sm:$0xff] }
 0x6b8   :  { %v1907_v32 = vmul.f32 %v3216_v27, %v3780_v41  ;;  %v3218_v37 = vpop.eup %3217 }
 0x6ba   :  { %v3822_v35 = vadd.f32 %v1908_v28, %v1907_v32 }
 0x6bc   :  { %3219 = vtanh.f32 %v3822_v35 }
 0x6c6   :  { %v3220_v40 = vpop.eup %3219 }
 0x6c7   :  { %v1911_v55 = vmul.f32 %v3220_v40, %v3218_v37 }
 0x6c9   :  { %1984 = vmatmul.mubr.f32.vlgmr.msra.gmra.mrb[12].mxu0 %v1911_v55  ;;  %2055 = vmatmul.mubr.f32.vlgmr.msra.gmra.mrb[12].mxu1 %v1911_v55 }
 0x6ca   :  { %2959 = vmatpush1.bf16.msra.mxu0 %v3436_v4  ;;  %2991 = vmatpush1.bf16.msra.mxu1 %v3439_v7 }
 0x6cb   :  { %2961 = vmatprep.subr.bf16.mxu0 %v3441_v10  ;;  %2993 = vmatprep.subr.bf16.mxu1 %v3444_v13 }
 0x6cc   :  { %2160 = vmatprep.mubr.f32.mxu0 %v3335_v2  ;;  %2231 = vmatprep.mubr.f32.mxu1 %v3335_v2 }
 0x6ce   :  { %2963 = vmatpush1.bf16.msra.mxu0 %v3448_v17  ;;  %2995 = vmatpush1.bf16.msra.mxu1 %v3452_v20 }
 0x6cf   :  { %2965 = vmatprep.subr.bf16.mxu0 %v3456_v23  ;;  %2997 = vmatprep.subr.bf16.mxu1 %v3460_v26 }
 0x6d2   :  { %2967 = vmatpush1.bf16.msra.mxu0 %v3464_v30  ;;  %2999 = vmatpush1.bf16.msra.mxu1 %v3468_v33 }
 0x6d3   :  { %2969 = vmatprep.subr.bf16.mxu0 %v3472_v36  ;;  %3001 = vmatprep.subr.bf16.mxu1 %v3476_v39 }
 0x6d6   :  { %2971 = vmatpush1.bf16.msra.mxu0 %v3480_v43  ;;  %3003 = vmatpush1.bf16.msra.mxu1 %v3484_v46 }
 0x6d7   :  { %2973 = vmatprep.subr.bf16.mxu0 %v3488_v51  ;;  %3005 = vmatprep.subr.bf16.mxu1 %v3492_v54 }
 0x6da   :  { %2975 = vmatpush1.bf16.msra.mxu0 %v3496_v58  ;;  %3007 = vmatpush1.bf16.msra.mxu1 %v3500_v61 }
 0x6db   :  { %2977 = vmatprep.subr.bf16.mxu0 %v3504_v0  ;;  %3009 = vmatprep.subr.bf16.mxu1 %v3508_v5 }
 0x6de   :  { %2979 = vmatpush1.bf16.msra.mxu0 %v3512_v11  ;;  %3011 = vmatpush1.bf16.msra.mxu1 %v3516_v15 }
 0x6df   :  { %2981 = vmatprep.subr.bf16.mxu0 %v3520_v19  ;;  %3013 = vmatprep.subr.bf16.mxu1 %v3524_v24 }
 0x6e2   :  { %2983 = vmatpush1.bf16.msra.mxu0 %v3528_v29  ;;  %3015 = vmatpush1.bf16.msra.mxu1 %v3532_v34 }
 0x6e3   :  { %2985 = vmatprep.subr.bf16.mxu0 %v3536_v38  ;;  %3017 = vmatprep.subr.bf16.mxu1 %v3540_v42 }
 0x6e6   :  { %2987 = vmatpush1.bf16.msra.mxu0 %v3544_v45  ;;  %3019 = vmatpush1.bf16.msra.mxu1 %v3548_v47 }
 0x79c   :  { %v1985_v2 = vpop.f32.mrb[12].mxu0  ;;  %v2056_v4 = vpop.f32.mrb[12].mxu1 }
 0x79d   :  { %v3032_v7 = vadd.f32 %v1985_v2, %v3600_v57  ;;  %v1987_v10 = vpop.f32.mrb[13].mxu0  ;;  %v2058_v13 = vpop.f32.mrb[13].mxu1  ;;  %v3048_v33 = vadd.f32 %v2056_v4, %v3609_v21 }
 0x79e   :  { %v3033_v17 = vadd.f32 %v1987_v10, %v3602_v59  ;;  %v3049_v26 = vadd.f32 %v2058_v13, %v3606_v14 }
 0x79f   :  { %v2343_v20 = vmul.f32 -1.442695, %v3032_v7 }
 0x7a0   :  { %v2344_v23 = vmul.f32 -1.442695, %v3033_v17  ;;  %v2345_v30 = vmul.f32 -1.442695, %v3049_v26 }
 0x7a1   :  { %3221 = vpow2.f32 %v2343_v20 }
 0x7a2   :  { %3223 = vpow2.f32 %v2344_v23 }
 0x7a3   :  { %3225 = vpow2.f32 %v2345_v30 }
 0x7a4   :  { %3227 = vtanh.f32 %v3048_v33 }
 0x7ab   :  { %v3222_v36 = vpop.eup %3221 }
 0x7ac   :  { %v3224_v39 = vpop.eup %3223  ;;  %v2068_v43 = vadd.f32 1.0, %v3222_v36 }
 0x7ad   :  { %v2074_v46 = vadd.f32 1.0, %v3224_v39  ;;  %v3226_v51 = vpop.eup %3225 }
 0x7ae   :  { %3229 = vrcp.f32 %v2068_v43  ;;  %v3228_v54 = vpop.eup %3227  ;;  %v2081_v5 = vadd.f32 1.0, %v3226_v51 }
 0x7af   :  { %3231 = vrcp.f32 %v2074_v46 }
 0x7b0   :  { %3233 = vrcp.f32 %v2081_v5 }
 0x7b8   :  { %v3230_v58 = vpop.eup %3229 }
 0x7b9   :  { %v3232_v61 = vpop.eup %3231  ;;  %v2085_v0 = vmul.f32 %v3230_v58, %v3228_v54 }
 0x7ba   :  { %v2084_v11 = vmul.f32 %v3232_v61, %v3822_v35  ;;  %v3234_v19 = vpop.eup %3233 }
 0x7bc   :  { %v2086_v15 = vadd.f32 %v2085_v0, %v2084_v11 }
 0x7be   :  { %3235 = vtanh.f32 %v2086_v15 }
 0x7c8   :  { %v3236_v24 = vpop.eup %3235 }
 0x7c9   :  { %v2088_v29 = vmul.f32 %v3236_v24, %v3234_v19 }
 0x7cb   :  { %2161 = vmatmul.mubr.f32.vlgmr.msra.gmra.mrb[14].mxu0 %v2088_v29  ;;  %2232 = vmatmul.mubr.f32.vlgmr.msra.gmra.mrb[14].mxu1 %v2088_v29 }
 0x89e   :  { %v2162_v34 = vpop.f32.mrb[14].mxu0  ;;  %v2233_v38 = vpop.f32.mrb[14].mxu1 }
 0x89f   :  { %v3034_v42 = vadd.f32 %v2162_v34, %v3600_v57  ;;  %v2164_v45 = vpop.f32.mrb[15].mxu0  ;;  %v2235_v47 = vpop.f32.mrb[15].mxu1  ;;  %v3050_v52 = vadd.f32 %v2233_v38, %v3609_v21 }
 0x8a0   :  { %v3035_v41 = vadd.f32 %v2164_v45, %v3602_v59  ;;  %v3051_v44 = vadd.f32 %v2235_v47, %v3606_v14 }
 0x8a1   :  { %v2346_v56 = vmul.f32 -1.442695, %v3034_v42 }
 0x8a2   :  { %v2347_v60 = vmul.f32 -1.442695, %v3035_v41  ;;  %v2348_v48 = vmul.f32 -1.442695, %v3051_v44 }
 0x8a3   :  { %3237 = vpow2.f32 %v2346_v56 }
 0x8a4   :  { %3239 = vpow2.f32 %v2347_v60 }
 0x8a5   :  { %3241 = vpow2.f32 %v2348_v48 }
 0x8a6   :  { %3243 = vtanh.f32 %v3050_v52 }
 0x8ad   :  { %v3238_v53 = vpop.eup %3237 }
 0x8ae   :  { %v3240_v62 = vpop.eup %3239  ;;  %v2245_v63 = vadd.f32 1.0, %v3238_v53 }
 0x8af   :  { %v2251_v1 = vadd.f32 1.0, %v3240_v62  ;;  %v3242_v57 = vpop.eup %3241 }
 0x8b0   :  { %3245 = vrcp.f32 %v2245_v63  ;;  %v3244_v3 = vpop.eup %3243  ;;  %v2258_v9 = vadd.f32 1.0, %v3242_v57 }
 0x8b1   :  { %3247 = vrcp.f32 %v2251_v1 }
 0x8b2   :  { %3249 = vrcp.f32 %v2258_v9 }
 0x8ba   :  { %v3246_v59 = vpop.eup %3245 }
 0x8bb   :  { %v3248_v6 = vpop.eup %3247  ;;  %v2262_v8 = vmul.f32 %v3246_v59, %v3244_v3 }
 0x8bc   :  { %v2261_v49 = vmul.f32 %v3248_v6, %v2086_v15  ;;  %v3250_v14 = vpop.eup %3249 }
 0x8be   :  { %v2263_v12 = vadd.f32 %v2262_v8, %v2261_v49 }
 0x8c0   :  { %3251 = vtanh.f32 %v2263_v12 }
 0x8ca   :  { %v3252_v21 = vpop.eup %3251 }
 0x8cb   :  { %v2265_v16 = vmul.f32 %v3252_v21, %v3250_v14 }
 0x8cd   :  { %v2273_v18 = vmul.f32 %v2349_v50, %v2265_v16 }
 0x8cf   :  { %2274 = vadd.xlane.f32.xlu0 %v2273_v18 }
 0x95c   :  { %v2275_v25 = vpop.xlane.xlu0 %2274 }
 0x95d   :  { %v2283_v27 = vadd.f32 %v2350_v22, %v2275_v25 }
 0x95f   :  { %v2351_v28 = vmul.f32 -1.442695, %v2283_v27 }
 0x961   :  { %3253 = vpow2.f32 %v2351_v28 }
 0x96b   :  { %v3254_v31 = vpop.eup %3253 }
 0x96c   :  { %v2287_v32 = vadd.f32 1.0, %v3254_v31 }
 0x96e   :  { %3255 = vrcp.f32 %v2287_v32 }
 0x978   :  { %v3256_v35 = vpop.eup %3255 }
 0x979   :  { %2291 = vst.msk [vmem:[%s3878_s6] sm:$0xff] %vm2290_vm4, %v3256_v35 }
 0x97a   :  { %2296 = vsyncpa [#allocation5], 1 }
 0x97b   :  { %2297 = vsyncpa [#allocation7], 1 }

</bundles_post_ra>
